<compile_context>
chip_gen: v7x
topology: tpu7x:2x2x1
jax: 0.10.0
libtpu: 0.0.40
codegen_flags: <defaults>
</compile_context>

<pallas_src>
import jax
import jax.numpy as jnp
import numpy as np
from jax.experimental import pallas as pl
from jax.experimental.pallas import tpu as pltpu


def _hswish(v):
    # h_swish(x) = x * relu6(x + 3) / 6
    return v * jnp.clip(v + 3.0, 0.0, 6.0) * (1.0 / 6.0)


def _shift_flat(a, d):
    """b[:, s] = a[:, s + d] with zero fill; d is a static Python int."""
    if d == 0:
        return a
    B, S = a.shape
    if d > 0:
        pad = jnp.zeros((B, d), a.dtype)
        return jnp.concatenate([a[:, d:], pad], axis=1)
    pad = jnp.zeros((B, -d), a.dtype)
    return jnp.concatenate([pad, a[:, :S + d]], axis=1)


def stra_kernel(x_ref, ph_ref, pw_ref, eh_ref, ew_ref, m9_ref,
                w1_ref, b1_ref, w2_ref, b2_ref, w3_ref, b3_ref,
                w4_ref, bz_ref, out_ref):
    f32 = jnp.float32
    x = x_ref[...]                                   # (B, C, S)  with S = H*W
    B, c, S = x.shape
    h = eh_ref.shape[0]
    w = ew_ref.shape[0]
    mip = w1_ref.shape[0]

    # ---- pool_h / pool_w as lane-contraction matmuls (no 4D view needed) ----
    ph = jnp.broadcast_to(ph_ref[...], (B, S, h))            # one-hot / W
    pw = jnp.broadcast_to(pw_ref[...], (B, S, w))            # one-hot / H
    x_h = jnp.einsum('bcs,bsh->bch', x, ph,
                     preferred_element_type=f32)             # (B, C, H)
    x_w = jnp.einsum('bcs,bsw->bcw', x, pw,
                     preferred_element_type=f32)             # (B, C, W)

    # ---- conv1 (1x1, BN1 folded) + h_swish: two batched dots, no concat/split ----
    w1 = jnp.broadcast_to(w1_ref[...], (B, mip, c))
    b1 = b1_ref[...][None, :, :]                             # (1, mip, 1)
    a_h = _hswish(jnp.einsum('bmc,bch->bmh', w1, x_h,
                             preferred_element_type=f32) + b1)    # (B, mip, H)
    a_w = _hswish(jnp.einsum('bmc,bcw->bmw', w1, x_w,
                             preferred_element_type=f32) + b1)    # (B, mip, W)

    # ---- conv2 / conv3 (1x1) + sigmoid ----
    w2 = jnp.broadcast_to(w2_ref[...], (B, c, mip))
    w3 = jnp.broadcast_to(w3_ref[...], (B, c, mip))
    att_h = jax.nn.sigmoid(
        jnp.einsum('bcm,bmh->bch', w2, a_h, preferred_element_type=f32)
        + b2_ref[...][None, :, :])                            # (B, C, H)
    att_w = jax.nn.sigmoid(
        jnp.einsum('bcm,bmw->bcw', w3, a_w, preferred_element_type=f32)
        + b3_ref[...][None, :, :])                            # (B, C, W)

    # ---- expand per-row / per-col gates to the flat lane-dense layout ----
    eh = jnp.broadcast_to(eh_ref[...], (B, h, S))             # one-hot
    ew = jnp.broadcast_to(ew_ref[...], (B, w, S))             # one-hot
    att_h_f = jnp.einsum('bch,bhs->bcs', att_h, eh,
                         preferred_element_type=f32)          # (B, C, S)
    att_w_f = jnp.einsum('bcw,bws->bcs', att_w, ew,
                         preferred_element_type=f32)          # (B, C, S)

    # ---- conv4 (3x3, C->1, BN2 folded): channel-reduce once on the MXU,
    #      then 9 statically shifted masked adds on the flat layout ----
    w4 = jnp.broadcast_to(w4_ref[...], (B, 9, c))
    u = jnp.einsum('bkc,bcs->bks', w4, x,
                   preferred_element_type=f32)                # (B, 9, S)
    m9 = m9_ref[...]                                          # (9, S) {0,1} masks

    z = jnp.full((B, S), bz_ref[0], dtype=f32)
    k = 0
    for oi in (-1, 0, 1):
        for oj in (-1, 0, 1):
            d = oi * w + oj
            z = z + _shift_flat(u[:, k, :], d) * m9[k]
            k += 1
    z = _hswish(z)                                            # (B, S)

    # ---- final gated product, lane-dense store ----
    out_ref[...] = (x * att_w_f * att_h_f * z[:, None, :]).astype(out_ref.dtype)


def stra_forward(x, params, eps=1e-5, vmem_block_budget=8 << 20):
    n, c, h, w = x.shape
    S = h * w
    f32 = jnp.float32

    w1, b1 = params["w1"].astype(f32), params["b1"].astype(f32)
    w2, b2 = params["w2"].astype(f32), params["b2"].astype(f32)
    w3, b3 = params["w3"].astype(f32), params["b3"].astype(f32)
    w4, b4 = params["w4"].astype(f32), params["b4"].astype(f32)
    mip = w1.shape[0]

    # Fold eval-mode BN1 (per-mip-channel) into conv1.
    scale1 = params["bn1_gamma"] / jnp.sqrt(params["bn1_var"] + eps)
    shift1 = params["bn1_beta"] - params["bn1_mean"] * scale1
    w1f = w1 * scale1[:, None]
    b1f = (b1 * scale1 + shift1)[:, None]                   # (mip, 1)

    # Fold eval-mode BN2 (single channel) into conv4.
    scale2 = params["bn2_gamma"][0] / jnp.sqrt(params["bn2_var"][0] + eps)
    shift2 = params["bn2_beta"][0] - params["bn2_mean"][0] * scale2
    w4f = w4[0] * scale2                                     # (C, 3, 3)
    w4k = jnp.transpose(w4f, (1, 2, 0)).reshape(9, c)        # row k = 3*(oi+1)+(oj+1)
    bzf = jnp.asarray([b4[0] * scale2 + shift2], f32)        # scalar (SMEM)

    b2f = b2[:, None]
    b3f = b3[:, None]

    # Static helper matrices: pooling, row/col expansion, 3x3 tap validity masks.
    rows = np.arange(S) // w
    cols = np.arange(S) % w
    ph = np.zeros((S, h), np.float32); ph[np.arange(S), rows] = 1.0 / w
    pw = np.zeros((S, w), np.float32); pw[np.arange(S), cols] = 1.0 / h
    eh = np.zeros((h, S), np.float32); eh[rows, np.arange(S)] = 1.0
    ew = np.zeros((w, S), np.float32); ew[cols, np.arange(S)] = 1.0
    m9 = np.zeros((9, S), np.float32)
    k = 0
    for oi in (-1, 0, 1):
        for oj in (-1, 0, 1):
            m9[k] = ((rows + oi >= 0) & (rows + oi < h) &
                     (cols + oj >= 0) & (cols + oj < w)).astype(np.float32)
            k += 1

    # Pick the batch-block size against a rough per-batch VMEM footprint
    # (x/out/gating intermediates + broadcast helper matrices, f32).
    per_b = 4 * (6 * c * S + 2 * S * (h + w) + 16 * S)
    B = int(max(1, min(n, vmem_block_budget // max(per_b, 1))))
    while n % B:
        B -= 1

    x3 = x.reshape(n, c, S).astype(f32)       # free reshape; single HBM copy of x

    out3 = pl.pallas_call(
        stra_kernel,
        out_shape=jax.ShapeDtypeStruct((n, c, S), x.dtype),
        grid=(n // B,),
        in_specs=[
            pl.BlockSpec((B, c, S), lambda i: (i, 0, 0)),       # x (flat)
            pl.BlockSpec((S, h), lambda i: (0, 0)),             # pool_h matrix
            pl.BlockSpec((S, w), lambda i: (0, 0)),             # pool_w matrix
            pl.BlockSpec((h, S), lambda i: (0, 0)),             # expand_h matrix
            pl.BlockSpec((w, S), lambda i: (0, 0)),             # expand_w matrix
            pl.BlockSpec((9, S), lambda i: (0, 0)),             # conv4 tap masks
            pl.BlockSpec((mip, c), lambda i: (0, 0)),           # w1 (BN1 folded)
            pl.BlockSpec((mip, 1), lambda i: (0, 0)),           # b1 (folded)
            pl.BlockSpec((c, mip), lambda i: (0, 0)),           # w2
            pl.BlockSpec((c, 1), lambda i: (0, 0)),             # b2
            pl.BlockSpec((c, mip), lambda i: (0, 0)),           # w3
            pl.BlockSpec((c, 1), lambda i: (0, 0)),             # b3
            pl.BlockSpec((9, c), lambda i: (0, 0)),             # w4 taps (BN2 folded)
            pl.BlockSpec(memory_space=pltpu.MemorySpace.SMEM),  # conv4 bias scalar
        ],
        out_specs=pl.BlockSpec((B, c, S), lambda i: (i, 0, 0)),
        compiler_params=pltpu.CompilerParams(
            dimension_semantics=("parallel",),
            vmem_limit_bytes=48 * 1024 * 1024),
    )(x3, jnp.asarray(ph), jnp.asarray(pw), jnp.asarray(eh), jnp.asarray(ew),
      jnp.asarray(m9), w1f, b1f, w2, b2f, w3, b3f, w4k, bzf)

    return out3.reshape(n, c, h, w)


# ---------------- pure-JAX reference (mirrors the PyTorch forward) ----------------
def _bn_eval(v, gamma, beta, mean, var, eps=1e-5):
    shape = (1, -1, 1, 1)
    return (v - mean.reshape(shape)) / jnp.sqrt(var.reshape(shape) + eps) \
        * gamma.reshape(shape) + beta.reshape(shape)


def stra_reference(x, params, eps=1e-5):
    n, c, h, w = x.shape
    x_h = jnp.mean(x, axis=3, keepdims=True)                   # (n,c,h,1)
    x_w = jnp.mean(x, axis=2, keepdims=True)                   # (n,c,1,w)
    x_w = jnp.transpose(x_w, (0, 1, 3, 2))                     # (n,c,w,1)
    y = jnp.concatenate([x_h, x_w], axis=2)                    # (n,c,h+w,1)
    y = jnp.einsum("oi,nihw->nohw", params["w1"], y) + params["b1"].reshape(1, -1, 1, 1)
    y = _bn_eval(y, params["bn1_gamma"], params["bn1_beta"],
                 params["bn1_mean"], params["bn1_var"], eps)
    y = _hswish(y)
    z = jax.lax.conv_general_dilated(
        x, params["w4"], window_strides=(1, 1), padding="SAME",
        dimension_numbers=("NCHW", "OIHW", "NCHW")) + params["b4"].reshape(1, -1, 1, 1)
    z = _bn_eval(z, params["bn2_gamma"], params["bn2_beta"],
                 params["bn2_mean"], params["bn2_var"], eps)
    z = _hswish(z)
    xh, xw = y[:, :, :h, :], y[:, :, h:, :]
    xw = jnp.transpose(xw, (0, 1, 3, 2))
    xh = jax.nn.sigmoid(jnp.einsum("oi,nihw->nohw", params["w2"], xh)
                        + params["b2"].reshape(1, -1, 1, 1))
    xw = jax.nn.sigmoid(jnp.einsum("oi,nihw->nohw", params["w3"], xw)
                        + params["b3"].reshape(1, -1, 1, 1))
    return x * xw * xh * z


if __name__ == "__main__":
    n, c, h, w = 2, 4, 16, 16          # inp = oup = 4
    groups = 32
    mip = max(8, c // groups)          # = 8

    key = jax.random.PRNGKey(0)
    keys = jax.random.split(key, 9)
    params = {
        "w1": jax.random.normal(keys[0], (mip, c), jnp.float32) * 0.2,
        "b1": jax.random.normal(keys[1], (mip,), jnp.float32) * 0.1,
        "w2": jax.random.normal(keys[2], (c, mip), jnp.float32) * 0.2,
        "b2": jax.random.normal(keys[3], (c,), jnp.float32) * 0.1,
        "w3": jax.random.normal(keys[4], (c, mip), jnp.float32) * 0.2,
        "b3": jax.random.normal(keys[5], (c,), jnp.float32) * 0.1,
        "w4": jax.random.normal(keys[6], (1, c, 3, 3), jnp.float32) * 0.2,
        "b4": jax.random.normal(keys[7], (1,), jnp.float32) * 0.1,
        # eval-mode BatchNorm parameters (PyTorch defaults)
        "bn1_gamma": jnp.ones((mip,), jnp.float32),
        "bn1_beta": jnp.zeros((mip,), jnp.float32),
        "bn1_mean": jnp.zeros((mip,), jnp.float32),
        "bn1_var": jnp.ones((mip,), jnp.float32),
        "bn2_gamma": jnp.ones((1,), jnp.float32),
        "bn2_beta": jnp.zeros((1,), jnp.float32),
        "bn2_mean": jnp.zeros((1,), jnp.float32),
        "bn2_var": jnp.ones((1,), jnp.float32),
    }
    x = jax.random.normal(keys[8], (n, c, h, w), jnp.float32)

    out = stra_forward(x, params)
    out = jax.block_until_ready(out)

    ref = jax.block_until_ready(stra_reference(x, params))
    assert out.shape == (n, c, h, w)
    np.testing.assert_allclose(np.asarray(out), np.asarray(ref), rtol=2e-4, atol=1e-5)

    print("KERNEL_OK")
</pallas_src>

<mosaic_0001>
module attributes {stable_mosaic.version = 11 : i64} {
  func.func @stra_kernel(%arg0: i32, %arg1: memref<2x4x256xf32, #tpu.memory_space<vmem>>, %arg2: memref<256x16xf32, #tpu.memory_space<vmem>>, %arg3: memref<256x16xf32, #tpu.memory_space<vmem>>, %arg4: memref<16x256xf32, #tpu.memory_space<vmem>>, %arg5: memref<16x256xf32, #tpu.memory_space<vmem>>, %arg6: memref<9x256xf32, #tpu.memory_space<vmem>>, %arg7: memref<8x4xf32, #tpu.memory_space<vmem>>, %arg8: memref<8x1xf32, #tpu.memory_space<vmem>>, %arg9: memref<4x8xf32, #tpu.memory_space<vmem>>, %arg10: memref<4x1xf32, #tpu.memory_space<vmem>>, %arg11: memref<4x8xf32, #tpu.memory_space<vmem>>, %arg12: memref<4x1xf32, #tpu.memory_space<vmem>>, %arg13: memref<9x4xf32, #tpu.memory_space<vmem>>, %arg14: memref<1xf32, #tpu.memory_space<smem>>, %arg15: memref<2x4x256xf32, #tpu.memory_space<vmem>>) attributes {dimension_semantics = [#tpu.dimension_semantics<parallel>], iteration_bounds = array<i64: 1>, scalar_prefetch = 0 : i64, scratch_operands = 0 : i64, tpu.core_type = #tpu.core_type<tc>, window_params = [{transform_indices = @transform_0, window_bounds = array<i64: 2, 4, 256>}, {pipeline_mode = #tpu.pipeline_mode<synchronous>, transform_indices = @transform_1, window_bounds = array<i64: 256, 16>}, {pipeline_mode = #tpu.pipeline_mode<synchronous>, transform_indices = @transform_2, window_bounds = array<i64: 256, 16>}, {pipeline_mode = #tpu.pipeline_mode<synchronous>, transform_indices = @transform_3, window_bounds = array<i64: 16, 256>}, {pipeline_mode = #tpu.pipeline_mode<synchronous>, transform_indices = @transform_4, window_bounds = array<i64: 16, 256>}, {pipeline_mode = #tpu.pipeline_mode<synchronous>, transform_indices = @transform_5, window_bounds = array<i64: 9, 256>}, {pipeline_mode = #tpu.pipeline_mode<synchronous>, transform_indices = @transform_6, window_bounds = array<i64: 8, 4>}, {pipeline_mode = #tpu.pipeline_mode<synchronous>, transform_indices = @transform_7, window_bounds = array<i64: 8, 1>}, {pipeline_mode = #tpu.pipeline_mode<synchronous>, transform_indices = @transform_8, window_bounds = array<i64: 4, 8>}, {pipeline_mode = #tpu.pipeline_mode<synchronous>, transform_indices = @transform_9, window_bounds = array<i64: 4, 1>}, {pipeline_mode = #tpu.pipeline_mode<synchronous>, transform_indices = @transform_10, window_bounds = array<i64: 4, 8>}, {pipeline_mode = #tpu.pipeline_mode<synchronous>, transform_indices = @transform_11, window_bounds = array<i64: 4, 1>}, {pipeline_mode = #tpu.pipeline_mode<synchronous>, transform_indices = @transform_12, window_bounds = array<i64: 9, 4>}, {transform_indices = @transform_13, window_bounds = array<i64: 1>}, {transform_indices = @transform_14, window_bounds = array<i64: 2, 4, 256>}]} {
    %c0 = arith.constant 0 : index
    %c0_0 = arith.constant 0 : index
    %c0_1 = arith.constant 0 : index
    %0 = vector.load %arg1[%c0, %c0_0, %c0_1] : memref<2x4x256xf32, #tpu.memory_space<vmem>>, vector<2x4x256xf32>
    %c0_2 = arith.constant 0 : index
    %c0_3 = arith.constant 0 : index
    %1 = vector.load %arg2[%c0_2, %c0_3] : memref<256x16xf32, #tpu.memory_space<vmem>>, vector<256x16xf32>
    %2 = vector.shape_cast %1 : vector<256x16xf32> to vector<1x256x16xf32>
    %3 = vector.broadcast %2 : vector<1x256x16xf32> to vector<2x256x16xf32>
    %c0_4 = arith.constant 0 : index
    %c0_5 = arith.constant 0 : index
    %4 = vector.load %arg3[%c0_4, %c0_5] : memref<256x16xf32, #tpu.memory_space<vmem>>, vector<256x16xf32>
    %5 = vector.shape_cast %4 : vector<256x16xf32> to vector<1x256x16xf32>
    %6 = vector.broadcast %5 : vector<1x256x16xf32> to vector<2x256x16xf32>
    "tpu.trace_start"() <{level = 10 : i32, message = "bcs,bsh->bch"}> : () -> ()
    %cst = arith.constant dense<0.000000e+00> : vector<2x4x16xf32>
    %7 = tpu.matmul %0, %3, %cst {dimension_numbers = #tpu.dot_dimension_numbers<[2], [1], [1], [2], [0, 0, 0, 1, 1, 2], [0], [0]>} : vector<2x4x256xf32>, vector<2x256x16xf32>, vector<2x4x16xf32> -> vector<2x4x16xf32>
    "tpu.trace_stop"() : () -> ()
    "tpu.trace_start"() <{level = 10 : i32, message = "bcs,bsw->bcw"}> : () -> ()
    %cst_6 = arith.constant dense<0.000000e+00> : vector<2x4x16xf32>
    %8 = tpu.matmul %0, %6, %cst_6 {dimension_numbers = #tpu.dot_dimension_numbers<[2], [1], [1], [2], [0, 0, 0, 1, 1, 2], [0], [0]>} : vector<2x4x256xf32>, vector<2x256x16xf32>, vector<2x4x16xf32> -> vector<2x4x16xf32>
    "tpu.trace_stop"() : () -> ()
    %c0_7 = arith.constant 0 : index
    %c0_8 = arith.constant 0 : index
    %9 = vector.load %arg7[%c0_7, %c0_8] : memref<8x4xf32, #tpu.memory_space<vmem>>, vector<8x4xf32>
    %10 = vector.shape_cast %9 : vector<8x4xf32> to vector<1x8x4xf32>
    %11 = vector.broadcast %10 : vector<1x8x4xf32> to vector<2x8x4xf32>
    %c0_9 = arith.constant 0 : index
    %c0_10 = arith.constant 0 : index
    %12 = vector.load %arg8[%c0_9, %c0_10] : memref<8x1xf32, #tpu.memory_space<vmem>>, vector<8x1xf32>
    %13 = vector.shape_cast %12 : vector<8x1xf32> to vector<1x8x1xf32>
    "tpu.trace_start"() <{level = 10 : i32, message = "bmc,bch->bmh"}> : () -> ()
    %cst_11 = arith.constant dense<0.000000e+00> : vector<2x8x16xf32>
    %14 = tpu.matmul %11, %7, %cst_11 {dimension_numbers = #tpu.dot_dimension_numbers<[2], [1], [1], [2], [0, 0, 0, 1, 1, 2], [0], [0]>} : vector<2x8x4xf32>, vector<2x4x16xf32>, vector<2x8x16xf32> -> vector<2x8x16xf32>
    "tpu.trace_stop"() : () -> ()
    %15 = vector.broadcast %13 : vector<1x8x1xf32> to vector<2x8x16xf32>
    %16 = arith.addf %14, %15 : vector<2x8x16xf32>
    %cst_12 = arith.constant 3.000000e+00 : f32
    %17 = vector.broadcast %cst_12 : f32 to vector<2x8x16xf32>
    %18 = arith.addf %16, %17 : vector<2x8x16xf32>
    %cst_13 = arith.constant 0.000000e+00 : f32
    %cst_14 = arith.constant 6.000000e+00 : f32
    %19 = vector.broadcast %cst_13 : f32 to vector<2x8x16xf32>
    %20 = arith.maximumf %19, %18 : vector<2x8x16xf32>
    %21 = vector.broadcast %cst_14 : f32 to vector<2x8x16xf32>
    %22 = arith.minimumf %21, %20 : vector<2x8x16xf32>
    %23 = arith.mulf %16, %22 : vector<2x8x16xf32>
    %cst_15 = arith.constant 0.166666672 : f32
    %24 = vector.broadcast %cst_15 : f32 to vector<2x8x16xf32>
    %25 = arith.mulf %23, %24 : vector<2x8x16xf32>
    "tpu.trace_start"() <{level = 10 : i32, message = "bmc,bcw->bmw"}> : () -> ()
    %cst_16 = arith.constant dense<0.000000e+00> : vector<2x8x16xf32>
    %26 = tpu.matmul %11, %8, %cst_16 {dimension_numbers = #tpu.dot_dimension_numbers<[2], [1], [1], [2], [0, 0, 0, 1, 1, 2], [0], [0]>} : vector<2x8x4xf32>, vector<2x4x16xf32>, vector<2x8x16xf32> -> vector<2x8x16xf32>
    "tpu.trace_stop"() : () -> ()
    %27 = vector.broadcast %13 : vector<1x8x1xf32> to vector<2x8x16xf32>
    %28 = arith.addf %26, %27 : vector<2x8x16xf32>
    %cst_17 = arith.constant 3.000000e+00 : f32
    %29 = vector.broadcast %cst_17 : f32 to vector<2x8x16xf32>
    %30 = arith.addf %28, %29 : vector<2x8x16xf32>
    %cst_18 = arith.constant 0.000000e+00 : f32
    %cst_19 = arith.constant 6.000000e+00 : f32
    %31 = vector.broadcast %cst_18 : f32 to vector<2x8x16xf32>
    %32 = arith.maximumf %31, %30 : vector<2x8x16xf32>
    %33 = vector.broadcast %cst_19 : f32 to vector<2x8x16xf32>
    %34 = arith.minimumf %33, %32 : vector<2x8x16xf32>
    %35 = arith.mulf %28, %34 : vector<2x8x16xf32>
    %cst_20 = arith.constant 0.166666672 : f32
    %36 = vector.broadcast %cst_20 : f32 to vector<2x8x16xf32>
    %37 = arith.mulf %35, %36 : vector<2x8x16xf32>
    %c0_21 = arith.constant 0 : index
    %c0_22 = arith.constant 0 : index
    %38 = vector.load %arg9[%c0_21, %c0_22] : memref<4x8xf32, #tpu.memory_space<vmem>>, vector<4x8xf32>
    %39 = vector.shape_cast %38 : vector<4x8xf32> to vector<1x4x8xf32>
    %40 = vector.broadcast %39 : vector<1x4x8xf32> to vector<2x4x8xf32>
    %c0_23 = arith.constant 0 : index
    %c0_24 = arith.constant 0 : index
    %41 = vector.load %arg11[%c0_23, %c0_24] : memref<4x8xf32, #tpu.memory_space<vmem>>, vector<4x8xf32>
    %42 = vector.shape_cast %41 : vector<4x8xf32> to vector<1x4x8xf32>
    %43 = vector.broadcast %42 : vector<1x4x8xf32> to vector<2x4x8xf32>
    "tpu.trace_start"() <{level = 10 : i32, message = "bcm,bmh->bch"}> : () -> ()
    %cst_25 = arith.constant dense<0.000000e+00> : vector<2x4x16xf32>
    %44 = tpu.matmul %40, %25, %cst_25 {dimension_numbers = #tpu.dot_dimension_numbers<[2], [1], [1], [2], [0, 0, 0, 1, 1, 2], [0], [0]>} : vector<2x4x8xf32>, vector<2x8x16xf32>, vector<2x4x16xf32> -> vector<2x4x16xf32>
    "tpu.trace_stop"() : () -> ()
    %c0_26 = arith.constant 0 : index
    %c0_27 = arith.constant 0 : index
    %45 = vector.load %arg10[%c0_26, %c0_27] : memref<4x1xf32, #tpu.memory_space<vmem>>, vector<4x1xf32>
    %46 = vector.shape_cast %45 : vector<4x1xf32> to vector<1x4x1xf32>
    %47 = vector.broadcast %46 : vector<1x4x1xf32> to vector<2x4x16xf32>
    %48 = arith.addf %44, %47 : vector<2x4x16xf32>
    %49 = arith.negf %48 : vector<2x4x16xf32>
    %50 = math.exp %49 : vector<2x4x16xf32>
    %cst_28 = arith.constant 1.000000e+00 : f32
    %51 = vector.broadcast %cst_28 : f32 to vector<2x4x16xf32>
    %52 = arith.addf %51, %50 : vector<2x4x16xf32>
    %53 = arith.divf %51, %52 : vector<2x4x16xf32>
    "tpu.trace_start"() <{level = 10 : i32, message = "bcm,bmw->bcw"}> : () -> ()
    %cst_29 = arith.constant dense<0.000000e+00> : vector<2x4x16xf32>
    %54 = tpu.matmul %43, %37, %cst_29 {dimension_numbers = #tpu.dot_dimension_numbers<[2], [1], [1], [2], [0, 0, 0, 1, 1, 2], [0], [0]>} : vector<2x4x8xf32>, vector<2x8x16xf32>, vector<2x4x16xf32> -> vector<2x4x16xf32>
    "tpu.trace_stop"() : () -> ()
    %c0_30 = arith.constant 0 : index
    %c0_31 = arith.constant 0 : index
    %55 = vector.load %arg12[%c0_30, %c0_31] : memref<4x1xf32, #tpu.memory_space<vmem>>, vector<4x1xf32>
    %56 = vector.shape_cast %55 : vector<4x1xf32> to vector<1x4x1xf32>
    %57 = vector.broadcast %56 : vector<1x4x1xf32> to vector<2x4x16xf32>
    %58 = arith.addf %54, %57 : vector<2x4x16xf32>
    %59 = arith.negf %58 : vector<2x4x16xf32>
    %60 = math.exp %59 : vector<2x4x16xf32>
    %cst_32 = arith.constant 1.000000e+00 : f32
    %61 = vector.broadcast %cst_32 : f32 to vector<2x4x16xf32>
    %62 = arith.addf %61, %60 : vector<2x4x16xf32>
    %63 = arith.divf %61, %62 : vector<2x4x16xf32>
    %c0_33 = arith.constant 0 : index
    %c0_34 = arith.constant 0 : index
    %64 = vector.load %arg4[%c0_33, %c0_34] : memref<16x256xf32, #tpu.memory_space<vmem>>, vector<16x256xf32>
    %65 = vector.shape_cast %64 : vector<16x256xf32> to vector<1x16x256xf32>
    %66 = vector.broadcast %65 : vector<1x16x256xf32> to vector<2x16x256xf32>
    %c0_35 = arith.constant 0 : index
    %c0_36 = arith.constant 0 : index
    %67 = vector.load %arg5[%c0_35, %c0_36] : memref<16x256xf32, #tpu.memory_space<vmem>>, vector<16x256xf32>
    %68 = vector.shape_cast %67 : vector<16x256xf32> to vector<1x16x256xf32>
    %69 = vector.broadcast %68 : vector<1x16x256xf32> to vector<2x16x256xf32>
    "tpu.trace_start"() <{level = 10 : i32, message = "bch,bhs->bcs"}> : () -> ()
    %cst_37 = arith.constant dense<0.000000e+00> : vector<2x4x256xf32>
    %70 = tpu.matmul %53, %66, %cst_37 {dimension_numbers = #tpu.dot_dimension_numbers<[2], [1], [1], [2], [0, 0, 0, 1, 1, 2], [0], [0]>} : vector<2x4x16xf32>, vector<2x16x256xf32>, vector<2x4x256xf32> -> vector<2x4x256xf32>
    "tpu.trace_stop"() : () -> ()
    "tpu.trace_start"() <{level = 10 : i32, message = "bcw,bws->bcs"}> : () -> ()
    %cst_38 = arith.constant dense<0.000000e+00> : vector<2x4x256xf32>
    %71 = tpu.matmul %63, %69, %cst_38 {dimension_numbers = #tpu.dot_dimension_numbers<[2], [1], [1], [2], [0, 0, 0, 1, 1, 2], [0], [0]>} : vector<2x4x16xf32>, vector<2x16x256xf32>, vector<2x4x256xf32> -> vector<2x4x256xf32>
    "tpu.trace_stop"() : () -> ()
    %c0_39 = arith.constant 0 : index
    %c0_40 = arith.constant 0 : index
    %72 = vector.load %arg13[%c0_39, %c0_40] : memref<9x4xf32, #tpu.memory_space<vmem>>, vector<9x4xf32>
    %73 = vector.shape_cast %72 : vector<9x4xf32> to vector<1x9x4xf32>
    %74 = vector.broadcast %73 : vector<1x9x4xf32> to vector<2x9x4xf32>
    "tpu.trace_start"() <{level = 10 : i32, message = "bkc,bcs->bks"}> : () -> ()
    %cst_41 = arith.constant dense<0.000000e+00> : vector<2x9x256xf32>
    %75 = tpu.matmul %74, %0, %cst_41 {dimension_numbers = #tpu.dot_dimension_numbers<[2], [1], [1], [2], [0, 0, 0, 1, 1, 2], [0], [0]>} : vector<2x9x4xf32>, vector<2x4x256xf32>, vector<2x9x256xf32> -> vector<2x9x256xf32>
    "tpu.trace_stop"() : () -> ()
    %c0_42 = arith.constant 0 : index
    %c0_43 = arith.constant 0 : index
    %76 = vector.load %arg6[%c0_42, %c0_43] : memref<9x256xf32, #tpu.memory_space<vmem>>, vector<9x256xf32>
    %c0_44 = arith.constant 0 : index
    %77 = memref.load %arg14[%c0_44] : memref<1xf32, #tpu.memory_space<smem>>
    %78 = vector.broadcast %77 : f32 to vector<2x256xf32>
    %79 = vector.extract_strided_slice %75 {offsets = [0, 0, 0], sizes = [2, 1, 256], strides = [1, 1, 1]} : vector<2x9x256xf32> to vector<2x1x256xf32>
    %80 = vector.shape_cast %79 : vector<2x1x256xf32> to vector<2x256xf32>
    %cst_45 = arith.constant 0.000000e+00 : f32
    %81 = vector.broadcast %cst_45 : f32 to vector<2x17xf32>
    %82 = vector.extract_strided_slice %80 {offsets = [0, 0], sizes = [2, 239], strides = [1, 1]} : vector<2x256xf32> to vector<2x239xf32>
    %83 = tpu.concatenate %81, %82 in 1 : vector<2x17xf32>, vector<2x239xf32> -> vector<2x256xf32>
    %84 = vector.extract_strided_slice %76 {offsets = [0, 0], sizes = [1, 256], strides = [1, 1]} : vector<9x256xf32> to vector<1x256xf32>
    %85 = vector.shape_cast %84 : vector<1x256xf32> to vector<256xf32>
    %86 = vector.shape_cast %85 : vector<256xf32> to vector<1x256xf32>
    %87 = vector.broadcast %86 : vector<1x256xf32> to vector<2x256xf32>
    %88 = arith.mulf %83, %87 : vector<2x256xf32>
    %89 = arith.addf %78, %88 : vector<2x256xf32>
    %90 = vector.extract_strided_slice %75 {offsets = [0, 1, 0], sizes = [2, 1, 256], strides = [1, 1, 1]} : vector<2x9x256xf32> to vector<2x1x256xf32>
    %91 = vector.shape_cast %90 : vector<2x1x256xf32> to vector<2x256xf32>
    %cst_46 = arith.constant 0.000000e+00 : f32
    %92 = vector.broadcast %cst_46 : f32 to vector<2x16xf32>
    %93 = vector.extract_strided_slice %91 {offsets = [0, 0], sizes = [2, 240], strides = [1, 1]} : vector<2x256xf32> to vector<2x240xf32>
    %94 = tpu.concatenate %92, %93 in 1 : vector<2x16xf32>, vector<2x240xf32> -> vector<2x256xf32>
    %95 = vector.extract_strided_slice %76 {offsets = [1, 0], sizes = [1, 256], strides = [1, 1]} : vector<9x256xf32> to vector<1x256xf32>
    %96 = vector.shape_cast %95 : vector<1x256xf32> to vector<256xf32>
    %97 = vector.shape_cast %96 : vector<256xf32> to vector<1x256xf32>
    %98 = vector.broadcast %97 : vector<1x256xf32> to vector<2x256xf32>
    %99 = arith.mulf %94, %98 : vector<2x256xf32>
    %100 = arith.addf %89, %99 : vector<2x256xf32>
    %101 = vector.extract_strided_slice %75 {offsets = [0, 2, 0], sizes = [2, 1, 256], strides = [1, 1, 1]} : vector<2x9x256xf32> to vector<2x1x256xf32>
    %102 = vector.shape_cast %101 : vector<2x1x256xf32> to vector<2x256xf32>
    %cst_47 = arith.constant 0.000000e+00 : f32
    %103 = vector.broadcast %cst_47 : f32 to vector<2x15xf32>
    %104 = vector.extract_strided_slice %102 {offsets = [0, 0], sizes = [2, 241], strides = [1, 1]} : vector<2x256xf32> to vector<2x241xf32>
    %105 = tpu.concatenate %103, %104 in 1 : vector<2x15xf32>, vector<2x241xf32> -> vector<2x256xf32>
    %106 = vector.extract_strided_slice %76 {offsets = [2, 0], sizes = [1, 256], strides = [1, 1]} : vector<9x256xf32> to vector<1x256xf32>
    %107 = vector.shape_cast %106 : vector<1x256xf32> to vector<256xf32>
    %108 = vector.shape_cast %107 : vector<256xf32> to vector<1x256xf32>
    %109 = vector.broadcast %108 : vector<1x256xf32> to vector<2x256xf32>
    %110 = arith.mulf %105, %109 : vector<2x256xf32>
    %111 = arith.addf %100, %110 : vector<2x256xf32>
    %112 = vector.extract_strided_slice %75 {offsets = [0, 3, 0], sizes = [2, 1, 256], strides = [1, 1, 1]} : vector<2x9x256xf32> to vector<2x1x256xf32>
    %113 = vector.shape_cast %112 : vector<2x1x256xf32> to vector<2x256xf32>
    %cst_48 = arith.constant 0.000000e+00 : f32
    %114 = vector.broadcast %cst_48 : f32 to vector<2x1xf32>
    %115 = vector.extract_strided_slice %113 {offsets = [0, 0], sizes = [2, 255], strides = [1, 1]} : vector<2x256xf32> to vector<2x255xf32>
    %116 = tpu.concatenate %114, %115 in 1 : vector<2x1xf32>, vector<2x255xf32> -> vector<2x256xf32>
    %117 = vector.extract_strided_slice %76 {offsets = [3, 0], sizes = [1, 256], strides = [1, 1]} : vector<9x256xf32> to vector<1x256xf32>
    %118 = vector.shape_cast %117 : vector<1x256xf32> to vector<256xf32>
    %119 = vector.shape_cast %118 : vector<256xf32> to vector<1x256xf32>
    %120 = vector.broadcast %119 : vector<1x256xf32> to vector<2x256xf32>
    %121 = arith.mulf %116, %120 : vector<2x256xf32>
    %122 = arith.addf %111, %121 : vector<2x256xf32>
    %123 = vector.extract_strided_slice %75 {offsets = [0, 4, 0], sizes = [2, 1, 256], strides = [1, 1, 1]} : vector<2x9x256xf32> to vector<2x1x256xf32>
    %124 = vector.shape_cast %123 : vector<2x1x256xf32> to vector<2x256xf32>
    %125 = vector.extract_strided_slice %76 {offsets = [4, 0], sizes = [1, 256], strides = [1, 1]} : vector<9x256xf32> to vector<1x256xf32>
    %126 = vector.shape_cast %125 : vector<1x256xf32> to vector<256xf32>
    %127 = vector.shape_cast %126 : vector<256xf32> to vector<1x256xf32>
    %128 = vector.broadcast %127 : vector<1x256xf32> to vector<2x256xf32>
    %129 = arith.mulf %124, %128 : vector<2x256xf32>
    %130 = arith.addf %122, %129 : vector<2x256xf32>
    %131 = vector.extract_strided_slice %75 {offsets = [0, 5, 0], sizes = [2, 1, 256], strides = [1, 1, 1]} : vector<2x9x256xf32> to vector<2x1x256xf32>
    %132 = vector.shape_cast %131 : vector<2x1x256xf32> to vector<2x256xf32>
    %cst_49 = arith.constant 0.000000e+00 : f32
    %133 = vector.broadcast %cst_49 : f32 to vector<2x1xf32>
    %134 = vector.extract_strided_slice %132 {offsets = [0, 1], sizes = [2, 255], strides = [1, 1]} : vector<2x256xf32> to vector<2x255xf32>
    %135 = tpu.concatenate %134, %133 in 1 : vector<2x255xf32>, vector<2x1xf32> -> vector<2x256xf32>
    %136 = vector.extract_strided_slice %76 {offsets = [5, 0], sizes = [1, 256], strides = [1, 1]} : vector<9x256xf32> to vector<1x256xf32>
    %137 = vector.shape_cast %136 : vector<1x256xf32> to vector<256xf32>
    %138 = vector.shape_cast %137 : vector<256xf32> to vector<1x256xf32>
    %139 = vector.broadcast %138 : vector<1x256xf32> to vector<2x256xf32>
    %140 = arith.mulf %135, %139 : vector<2x256xf32>
    %141 = arith.addf %130, %140 : vector<2x256xf32>
    %142 = vector.extract_strided_slice %75 {offsets = [0, 6, 0], sizes = [2, 1, 256], strides = [1, 1, 1]} : vector<2x9x256xf32> to vector<2x1x256xf32>
    %143 = vector.shape_cast %142 : vector<2x1x256xf32> to vector<2x256xf32>
    %cst_50 = arith.constant 0.000000e+00 : f32
    %144 = vector.broadcast %cst_50 : f32 to vector<2x15xf32>
    %145 = vector.extract_strided_slice %143 {offsets = [0, 15], sizes = [2, 241], strides = [1, 1]} : vector<2x256xf32> to vector<2x241xf32>
    %146 = tpu.concatenate %145, %144 in 1 : vector<2x241xf32>, vector<2x15xf32> -> vector<2x256xf32>
    %147 = vector.extract_strided_slice %76 {offsets = [6, 0], sizes = [1, 256], strides = [1, 1]} : vector<9x256xf32> to vector<1x256xf32>
    %148 = vector.shape_cast %147 : vector<1x256xf32> to vector<256xf32>
    %149 = vector.shape_cast %148 : vector<256xf32> to vector<1x256xf32>
    %150 = vector.broadcast %149 : vector<1x256xf32> to vector<2x256xf32>
    %151 = arith.mulf %146, %150 : vector<2x256xf32>
    %152 = arith.addf %141, %151 : vector<2x256xf32>
    %153 = vector.extract_strided_slice %75 {offsets = [0, 7, 0], sizes = [2, 1, 256], strides = [1, 1, 1]} : vector<2x9x256xf32> to vector<2x1x256xf32>
    %154 = vector.shape_cast %153 : vector<2x1x256xf32> to vector<2x256xf32>
    %cst_51 = arith.constant 0.000000e+00 : f32
    %155 = vector.broadcast %cst_51 : f32 to vector<2x16xf32>
    %156 = vector.extract_strided_slice %154 {offsets = [0, 16], sizes = [2, 240], strides = [1, 1]} : vector<2x256xf32> to vector<2x240xf32>
    %157 = tpu.concatenate %156, %155 in 1 : vector<2x240xf32>, vector<2x16xf32> -> vector<2x256xf32>
    %158 = vector.extract_strided_slice %76 {offsets = [7, 0], sizes = [1, 256], strides = [1, 1]} : vector<9x256xf32> to vector<1x256xf32>
    %159 = vector.shape_cast %158 : vector<1x256xf32> to vector<256xf32>
    %160 = vector.shape_cast %159 : vector<256xf32> to vector<1x256xf32>
    %161 = vector.broadcast %160 : vector<1x256xf32> to vector<2x256xf32>
    %162 = arith.mulf %157, %161 : vector<2x256xf32>
    %163 = arith.addf %152, %162 : vector<2x256xf32>
    %164 = vector.extract_strided_slice %75 {offsets = [0, 8, 0], sizes = [2, 1, 256], strides = [1, 1, 1]} : vector<2x9x256xf32> to vector<2x1x256xf32>
    %165 = vector.shape_cast %164 : vector<2x1x256xf32> to vector<2x256xf32>
    %cst_52 = arith.constant 0.000000e+00 : f32
    %166 = vector.broadcast %cst_52 : f32 to vector<2x17xf32>
    %167 = vector.extract_strided_slice %165 {offsets = [0, 17], sizes = [2, 239], strides = [1, 1]} : vector<2x256xf32> to vector<2x239xf32>
    %168 = tpu.concatenate %167, %166 in 1 : vector<2x239xf32>, vector<2x17xf32> -> vector<2x256xf32>
    %169 = vector.extract_strided_slice %76 {offsets = [8, 0], sizes = [1, 256], strides = [1, 1]} : vector<9x256xf32> to vector<1x256xf32>
    %170 = vector.shape_cast %169 : vector<1x256xf32> to vector<256xf32>
    %171 = vector.shape_cast %170 : vector<256xf32> to vector<1x256xf32>
    %172 = vector.broadcast %171 : vector<1x256xf32> to vector<2x256xf32>
    %173 = arith.mulf %168, %172 : vector<2x256xf32>
    %174 = arith.addf %163, %173 : vector<2x256xf32>
    %cst_53 = arith.constant 3.000000e+00 : f32
    %175 = vector.broadcast %cst_53 : f32 to vector<2x256xf32>
    %176 = arith.addf %174, %175 : vector<2x256xf32>
    %cst_54 = arith.constant 0.000000e+00 : f32
    %cst_55 = arith.constant 6.000000e+00 : f32
    %177 = vector.broadcast %cst_54 : f32 to vector<2x256xf32>
    %178 = arith.maximumf %177, %176 : vector<2x256xf32>
    %179 = vector.broadcast %cst_55 : f32 to vector<2x256xf32>
    %180 = arith.minimumf %179, %178 : vector<2x256xf32>
    %181 = arith.mulf %174, %180 : vector<2x256xf32>
    %cst_56 = arith.constant 0.166666672 : f32
    %182 = vector.broadcast %cst_56 : f32 to vector<2x256xf32>
    %183 = arith.mulf %181, %182 : vector<2x256xf32>
    %184 = arith.mulf %0, %71 : vector<2x4x256xf32>
    %185 = arith.mulf %184, %70 : vector<2x4x256xf32>
    %186 = vector.shape_cast %183 : vector<2x256xf32> to vector<2x1x256xf32>
    %187 = vector.broadcast %186 : vector<2x1x256xf32> to vector<2x4x256xf32>
    %188 = arith.mulf %185, %187 : vector<2x4x256xf32>
    %c0_57 = arith.constant 0 : index
    %c0_58 = arith.constant 0 : index
    %c0_59 = arith.constant 0 : index
    %189 = vector.load %arg15[%c0_57, %c0_58, %c0_59] : memref<2x4x256xf32, #tpu.memory_space<vmem>>, vector<2x4x256xf32>
    tpu.vector_store %arg15[%c0_57, %c0_58, %c0_59], %188 {strides = array<i32>} : memref<2x4x256xf32, #tpu.memory_space<vmem>>, vector<2x4x256xf32>,
    return
  }
  func.func @transform_0(%arg0: i32) -> (i32, i32, i32) {
    %c0_i32 = arith.constant 0 : i32
    %c0_i32_0 = arith.constant 0 : i32
    %c0_i32_1 = arith.constant 0 : i32
    return %arg0, %c0_i32, %c0_i32_0 : i32, i32, i32
  }
  func.func @transform_1(%arg0: i32) -> (i32, i32) {
    %c0_i32 = arith.constant 0 : i32
    %c0_i32_0 = arith.constant 0 : i32
    %c0_i32_1 = arith.constant 0 : i32
    return %c0_i32, %c0_i32_0 : i32, i32
  }
  func.func @transform_2(%arg0: i32) -> (i32, i32) {
    %c0_i32 = arith.constant 0 : i32
    %c0_i32_0 = arith.constant 0 : i32
    %c0_i32_1 = arith.constant 0 : i32
    return %c0_i32, %c0_i32_0 : i32, i32
  }
  func.func @transform_3(%arg0: i32) -> (i32, i32) {
    %c0_i32 = arith.constant 0 : i32
    %c0_i32_0 = arith.constant 0 : i32
    %c0_i32_1 = arith.constant 0 : i32
    return %c0_i32, %c0_i32_0 : i32, i32
  }
  func.func @transform_4(%arg0: i32) -> (i32, i32) {
    %c0_i32 = arith.constant 0 : i32
    %c0_i32_0 = arith.constant 0 : i32
    %c0_i32_1 = arith.constant 0 : i32
    return %c0_i32, %c0_i32_0 : i32, i32
  }
  func.func @transform_5(%arg0: i32) -> (i32, i32) {
    %c0_i32 = arith.constant 0 : i32
    %c0_i32_0 = arith.constant 0 : i32
    %c0_i32_1 = arith.constant 0 : i32
    return %c0_i32, %c0_i32_0 : i32, i32
  }
  func.func @transform_6(%arg0: i32) -> (i32, i32) {
    %c0_i32 = arith.constant 0 : i32
    %c0_i32_0 = arith.constant 0 : i32
    %c0_i32_1 = arith.constant 0 : i32
    return %c0_i32, %c0_i32_0 : i32, i32
  }
  func.func @transform_7(%arg0: i32) -> (i32, i32) {
    %c0_i32 = arith.constant 0 : i32
    %c0_i32_0 = arith.constant 0 : i32
    %c0_i32_1 = arith.constant 0 : i32
    return %c0_i32, %c0_i32_0 : i32, i32
  }
  func.func @transform_8(%arg0: i32) -> (i32, i32) {
    %c0_i32 = arith.constant 0 : i32
    %c0_i32_0 = arith.constant 0 : i32
    %c0_i32_1 = arith.constant 0 : i32
    return %c0_i32, %c0_i32_0 : i32, i32
  }
  func.func @transform_9(%arg0: i32) -> (i32, i32) {
    %c0_i32 = arith.constant 0 : i32
    %c0_i32_0 = arith.constant 0 : i32
    %c0_i32_1 = arith.constant 0 : i32
    return %c0_i32, %c0_i32_0 : i32, i32
  }
  func.func @transform_10(%arg0: i32) -> (i32, i32) {
    %c0_i32 = arith.constant 0 : i32
    %c0_i32_0 = arith.constant 0 : i32
    %c0_i32_1 = arith.constant 0 : i32
    return %c0_i32, %c0_i32_0 : i32, i32
  }
  func.func @transform_11(%arg0: i32) -> (i32, i32) {
    %c0_i32 = arith.constant 0 : i32
    %c0_i32_0 = arith.constant 0 : i32
    %c0_i32_1 = arith.constant 0 : i32
    return %c0_i32, %c0_i32_0 : i32, i32
  }
  func.func @transform_12(%arg0: i32) -> (i32, i32) {
    %c0_i32 = arith.constant 0 : i32
    %c0_i32_0 = arith.constant 0 : i32
    %c0_i32_1 = arith.constant 0 : i32
    return %c0_i32, %c0_i32_0 : i32, i32
  }
  func.func @transform_13(%arg0: i32) -> i32 {
    %c0_i32 = arith.constant 0 : i32
    %c0_i32_0 = arith.constant 0 : i32
    return %c0_i32 : i32
  }
  func.func @transform_14(%arg0: i32) -> (i32, i32, i32) {
    %c0_i32 = arith.constant 0 : i32
    %c0_i32_0 = arith.constant 0 : i32
    %c0_i32_1 = arith.constant 0 : i32
    return %arg0, %c0_i32, %c0_i32_0 : i32, i32, i32
  }
}

</mosaic_0001>

<bundles_post_ra>
// kernel: tpu_custom_call.1
= control target key start
LH: loop header
LB: loop body
LE: loop exit
PB: predicated region body
PF: predicated region fallthrough
CT: control target
= control target key end

     0   :  { %s2859_s0 = inlined_call_operand.vmem [shape: f32[2,4,256], index: 0, kind: input, shape index: {}]   ;;  %s2860_s1 = inlined_call_operand.vmem [shape: f32[256,16], index: 1, kind: input, shape index: {}]   ;;  %s2861_s2 = inlined_call_operand.vmem [shape: f32[256,16], index: 2, kind: input, shape index: {}]   ;;  %s2862_s3 = inlined_call_operand.vmem [shape: f32[16,256], index: 3, kind: input, shape index: {}]   ;;  %s2863_s4 = inlined_call_operand.vmem [shape: f32[16,256], index: 4, kind: input, shape index: {}]   ;;  %s2864_s5 = inlined_call_operand.vmem [shape: f32[9,256], index: 5, kind: input, shape index: {}]   ;;  %s2865_s6 = inlined_call_operand.vmem [shape: f32[8,4], index: 6, kind: input, shape index: {}]   ;;  %s2866_s7 = inlined_call_operand.vmem [shape: f32[8,1], index: 7, kind: input, shape index: {}]   ;;  %s2867_s8 = inlined_call_operand.vmem [shape: f32[4,8], index: 8, kind: input, shape index: {}]   ;;  %s2868_s9 = inlined_call_operand.vmem [shape: f32[4,1], index: 9, kind: input, shape index: {}]   ;;  %s2869_s10 = inlined_call_operand.vmem [shape: f32[4,8], index: 10, kind: input, shape index: {}]   ;;  %s2870_s11 = inlined_call_operand.vmem [shape: f32[4,1], index: 11, kind: input, shape index: {}]   ;;  %s2871_s12 = inlined_call_operand.vmem [shape: f32[9,4], index: 12, kind: input, shape index: {}]   ;;  %s2872_s13 = inlined_call_operand.<no memory space> [shape: f32[1], index: 13, kind: input, shape index: {}]   ;;  %s2873_s14 = inlined_call_operand.hbm [shape: f32[2,4,256], index: 14, kind: output, shape index: {}]  }
   0x1   :  { %v67_v0 = vld [vmem:[%s2860_s1 + $0x80] sm:$0xff]  ;;  %v68_v1 = vld [vmem:[%s2860_s1 + $0x88] sm:$0xff]  ;;  %v69_v5 = vld [vmem:[%s2860_s1 + $0x90] sm:$0xff] }
   0x2   :  { %v51_v2 = vld [vmem:[%s2860_s1] sm:$0xff]  ;;  %v2119_v3 = vpack.c.bf16 %v68_v1, %v67_v0  ;;  %v52_v4 = vld [vmem:[%s2860_s1 + $0x8] sm:$0xff]  ;;  %v70_v6 = vld [vmem:[%s2860_s1 + $0x98] sm:$0xff] }
   0x3   :  { %v2121_v7 = vpack.c.bf16 %v52_v4, %v51_v2  ;;  %v2123_v8 = vpack.c.bf16 %v70_v6, %v69_v5  ;;  %v53_v9 = vld [vmem:[%s2860_s1 + $0x10] sm:$0xff]  ;;  %v54_v10 = vld [vmem:[%s2860_s1 + $0x18] sm:$0xff]  ;;  %v71_v11 = vld [vmem:[%s2860_s1 + $0xa0] sm:$0xff] }
   0x4   :  { %2120 = vmatprep.subr.bf16.mxu0 %v2119_v3  ;;  %2152 = vmatprep.subr.bf16.mxu1 %v2119_v3  ;;  %v72_v12 = vld [vmem:[%s2860_s1 + $0xa8] sm:$0xff]  ;;  %v2125_v13 = vpack.c.bf16 %v54_v10, %v53_v9  ;;  %v55_v15 = vld [vmem:[%s2860_s1 + $0x20] sm:$0xff]  ;;  %v73_v17 = vld [vmem:[%s2860_s1 + $0xb0] sm:$0xff] }
   0x5   :  { %2122 = vmatpush3.bf16.msra.mxu0 %v2121_v7  ;;  %2154 = vmatpush3.bf16.msra.mxu1 %v2121_v7  ;;  %v2127_v14 = vpack.c.bf16 %v72_v12, %v71_v11  ;;  %v56_v16 = vld [vmem:[%s2860_s1 + $0x28] sm:$0xff]  ;;  %v74_v18 = vld [vmem:[%s2860_s1 + $0xb8] sm:$0xff]  ;;  %v57_v21 = vld [vmem:[%s2860_s1 + $0x30] sm:$0xff] }
   0x6   :  { %2124 = vmatprep.subr.bf16.mxu0 %v2123_v8  ;;  %2156 = vmatprep.subr.bf16.mxu1 %v2123_v8  ;;  %v2129_v19 = vpack.c.bf16 %v56_v16, %v55_v15  ;;  %v2131_v20 = vpack.c.bf16 %v74_v18, %v73_v17  ;;  %v58_v22 = vld [vmem:[%s2860_s1 + $0x38] sm:$0xff]  ;;  %v75_v23 = vld [vmem:[%s2860_s1 + $0xc0] sm:$0xff]  ;;  %v76_v24 = vld [vmem:[%s2860_s1 + $0xc8] sm:$0xff] }
   0x7   :  { %v2469_v25 = vld [vmem:[%s2859_s0] sm:$0xff]  ;;  %v2478_v27 = vld [vmem:[%s2859_s0 + $0x8] sm:$0xff]  ;;  %v2133_v28 = vpack.c.bf16 %v58_v22, %v57_v21  ;;  %v2135_v30 = vpack.c.bf16 %v76_v24, %v75_v23  ;;  %v77_v33 = vld [vmem:[%s2860_s1 + $0xd0] sm:$0xff] }
   0x8   :  { %v2473_v26 = vcombine.high %v2469_v25, %v2469_v25  ;;  %v2482_v29 = vcombine.high %v2478_v27, %v2478_v27  ;;  %v59_v31 = vld [vmem:[%s2860_s1 + $0x40] sm:$0xff]  ;;  %v60_v32 = vld [vmem:[%s2860_s1 + $0x48] sm:$0xff]  ;;  %v78_v34 = vld [vmem:[%s2860_s1 + $0xd8] sm:$0xff] }
   0x9   :  { %2126 = vmatpush3.bf16.msra.mxu0 %v2125_v13  ;;  %2158 = vmatpush3.bf16.msra.mxu1 %v2125_v13  ;;  %v2137_v35 = vpack.c.bf16 %v60_v32, %v59_v31  ;;  %v2139_v36 = vpack.c.bf16 %v78_v34, %v77_v33  ;;  %v61_v37 = vld [vmem:[%s2860_s1 + $0x50] sm:$0xff]  ;;  %v62_v38 = vld [vmem:[%s2860_s1 + $0x58] sm:$0xff]  ;;  %v79_v39 = vld [vmem:[%s2860_s1 + $0xe0] sm:$0xff] }
   0xa   :  { %2128 = vmatprep.subr.bf16.mxu0 %v2127_v14  ;;  %2160 = vmatprep.subr.bf16.mxu1 %v2127_v14  ;;  %v80_v40 = vld [vmem:[%s2860_s1 + $0xe8] sm:$0xff]  ;;  %v2141_v41 = vpack.c.bf16 %v62_v38, %v61_v37  ;;  %v63_v43 = vld [vmem:[%s2860_s1 + $0x60] sm:$0xff]  ;;  %v81_v45 = vld [vmem:[%s2860_s1 + $0xf0] sm:$0xff] }
   0xb   :  { %182 = vmatprep.mubr.f32.mxu0 %v2473_v26  ;;  %255 = vmatprep.mubr.f32.mxu1 %v2482_v29  ;;  %v2143_v42 = vpack.c.bf16 %v80_v40, %v79_v39  ;;  %v64_v44 = vld [vmem:[%s2860_s1 + $0x68] sm:$0xff]  ;;  %v82_v46 = vld [vmem:[%s2860_s1 + $0xf8] sm:$0xff] }
   0xd   :  { %2130 = vmatpush3.bf16.msra.mxu0 %v2129_v19  ;;  %2162 = vmatpush3.bf16.msra.mxu1 %v2129_v19 }
   0xe   :  { %2132 = vmatprep.subr.bf16.mxu0 %v2131_v20  ;;  %2164 = vmatprep.subr.bf16.mxu1 %v2131_v20 }
  0x11   :  { %2134 = vmatpush3.bf16.msra.mxu0 %v2133_v28  ;;  %2166 = vmatpush3.bf16.msra.mxu1 %v2133_v28 }
  0x12   :  { %2136 = vmatprep.subr.bf16.mxu0 %v2135_v30  ;;  %2168 = vmatprep.subr.bf16.mxu1 %v2135_v30 }
  0x15   :  { %2138 = vmatpush3.bf16.msra.mxu0 %v2137_v35  ;;  %2170 = vmatpush3.bf16.msra.mxu1 %v2137_v35 }
  0x16   :  { %2140 = vmatprep.subr.bf16.mxu0 %v2139_v36  ;;  %2172 = vmatprep.subr.bf16.mxu1 %v2139_v36 }
  0x17   :  { %20 = vsyncpa [#allocation4], 0  ;;  %v2145_v47 = vpack.c.bf16 %v64_v44, %v63_v43  ;;  %v2147_v48 = vpack.c.bf16 %v82_v46, %v81_v45  ;;  %v65_v49 = vld [vmem:[%s2860_s1 + $0x70] sm:$0xff]  ;;  %v66_v50 = vld [vmem:[%s2860_s1 + $0x78] sm:$0xff]  ;;  %v2322_v40 = vmov 0.0   ;;  %vm2323_vm0 = vmmov 0  }
  0x18   :  { %v99_v51 = vld [vmem:[%s2861_s2 + $0x80] sm:$0xff]  ;;  %v100_v52 = vld [vmem:[%s2861_s2 + $0x88] sm:$0xff]  ;;  %v2149_v53 = vpack.c.bf16 %v66_v50, %v65_v49  ;;  %v101_v57 = vld [vmem:[%s2861_s2 + $0x90] sm:$0xff]  ;;  %vm412_vm1 = vcmask 1043456   ;;  %vm408_vm2 = vcmask 31744   ;;  %vm733_vm3 = vcmask 64512  }
  0x19   :  { %2142 = vmatpush3.bf16.msra.mxu0 %v2141_v41  ;;  %2174 = vmatpush3.bf16.msra.mxu1 %v2141_v41  ;;  %v2183_v54 = vpack.c.bf16 %v100_v52, %v99_v51  ;;  %v83_v55 = vld [vmem:[%s2861_s2] sm:$0xff]  ;;  %v84_v56 = vld [vmem:[%s2861_s2 + $0x8] sm:$0xff]  ;;  %v102_v58 = vld [vmem:[%s2861_s2 + $0x98] sm:$0xff]  ;;  %vm1058_vm4 = vcmask 130048   ;;  %vm1536_vm5 = vcmask 1041409   ;;  %vm1665_vm6 = vcmask 1046534  }
  0x1a   :  { %2144 = vmatprep.subr.bf16.mxu0 %v2143_v42  ;;  %2176 = vmatprep.subr.bf16.mxu1 %v2143_v42  ;;  %v2185_v59 = vpack.c.bf16 %v84_v56, %v83_v55  ;;  %v2187_v60 = vpack.c.bf16 %v102_v58, %v101_v57  ;;  %v85_v61 = vld [vmem:[%s2861_s2 + $0x10] sm:$0xff]  ;;  %v86_v62 = vld [vmem:[%s2861_s2 + $0x18] sm:$0xff]  ;;  %v103_v63 = vld [vmem:[%s2861_s2 + $0xa0] sm:$0xff]  ;;  %v2324_v42 = vmov 0   ;;  %vm1695_vm7 = vcmask 1047559   ;;  %s2326_s28 = smov 17  }
  0x1b   :  { %v104_v0 = vld [vmem:[%s2861_s2 + $0xa8] sm:$0xff]  ;;  %v2189_v1 = vpack.c.bf16 %v86_v62, %v85_v61  ;;  %v87_v3 = vld [vmem:[%s2861_s2 + $0x20] sm:$0xff]  ;;  %v105_v5 = vld [vmem:[%s2861_s2 + $0xb0] sm:$0xff]  ;;  %2278 = vset.pattern.permute.xlu0 %v2324_v42  ;;  %2279 = vset.pattern.permute.xlu1 %v2324_v42  ;;  %s2329_s29 = smov 1   ;;  %s2330_s30 = smov 127   ;;  %vm1544_vm8 = vcmask 138240  }
  0x1c   :  { %v2191_v2 = vpack.c.bf16 %v104_v0, %v103_v63  ;;  %v88_v4 = vld [vmem:[%s2861_s2 + $0x28] sm:$0xff]  ;;  %v106_v6 = vld [vmem:[%s2861_s2 + $0xb8] sm:$0xff]  ;;  %v89_v9 = vld [vmem:[%s2861_s2 + $0x30] sm:$0xff]  ;;  %s2331_s15 = smov 113   ;;  %s2332_s16 = smov 111   ;;  %vm1595_vm9 = vcmask 121856  }
  0x1d   :  { %2146 = vmatpush3.bf16.msra.mxu0 %v2145_v47  ;;  %2178 = vmatpush3.bf16.msra.mxu1 %v2145_v47  ;;  %v2193_v7 = vpack.c.bf16 %v88_v4, %v87_v3  ;;  %v2195_v8 = vpack.c.bf16 %v106_v6, %v105_v5  ;;  %v90_v10 = vld [vmem:[%s2861_s2 + $0x38] sm:$0xff]  ;;  %v107_v11 = vld [vmem:[%s2861_s2 + $0xc0] sm:$0xff]  ;;  %v108_v12 = vld [vmem:[%s2861_s2 + $0xc8] sm:$0xff]  ;;  %vm1622_vm10 = vcmask 7168   ;;  %vm1672_vm11 = vcmask 1039360  }
  0x1e   :  { %2148 = vmatprep.subr.bf16.mxu0 %v2147_v48  ;;  %2180 = vmatprep.subr.bf16.mxu1 %v2147_v48  ;;  %v2197_v13 = vpack.c.bf16 %v90_v10, %v89_v9  ;;  %v2199_v14 = vpack.c.bf16 %v108_v12, %v107_v11  ;;  %v91_v15 = vld [vmem:[%s2861_s2 + $0x40] sm:$0xff]  ;;  %v92_v16 = vld [vmem:[%s2861_s2 + $0x48] sm:$0xff]  ;;  %v109_v17 = vld [vmem:[%s2861_s2 + $0xd0] sm:$0xff]  ;;  %vm1733_vm12 = vcmask 916480   ;;  %vm1702_vm13 = vcmask 924672  }
  0x1f   :  { %v110_v18 = vld [vmem:[%s2861_s2 + $0xd8] sm:$0xff]  ;;  %v2201_v19 = vpack.c.bf16 %v92_v16, %v91_v15  ;;  %v93_v21 = vld [vmem:[%s2861_s2 + $0x50] sm:$0xff]  ;;  %v111_v23 = vld [vmem:[%s2861_s2 + $0xe0] sm:$0xff]  ;;  %vm1781_vm14 = vcmask 908288   ;;  %vm1758_vm15 = vcmask 1040384  }
  0x20   :  { %v2203_v20 = vpack.c.bf16 %v110_v18, %v109_v17  ;;  %v94_v22 = vld [vmem:[%s2861_s2 + $0x58] sm:$0xff]  ;;  %v112_v24 = vld [vmem:[%s2861_s2 + $0xe8] sm:$0xff]  ;;  %v95_v31 = vld [vmem:[%s2861_s2 + $0x60] sm:$0xff] }
  0x21   :  { %2150 = vmatpush3.bf16.msra.mxu0 %v2149_v53  ;;  %2182 = vmatpush3.bf16.msra.mxu1 %v2149_v53  ;;  %v2205_v28 = vpack.c.bf16 %v94_v22, %v93_v21  ;;  %v2207_v30 = vpack.c.bf16 %v112_v24, %v111_v23  ;;  %v96_v32 = vld [vmem:[%s2861_s2 + $0x68] sm:$0xff]  ;;  %v113_v33 = vld [vmem:[%s2861_s2 + $0xf0] sm:$0xff]  ;;  %v114_v34 = vld [vmem:[%s2861_s2 + $0xf8] sm:$0xff] }
  0x22   :  { %2184 = vmatprep.subr.bf16.mxu0 %v2183_v54  ;;  %2216 = vmatprep.subr.bf16.mxu1 %v2183_v54  ;;  %v2209_v35 = vpack.c.bf16 %v96_v32, %v95_v31  ;;  %v2211_v36 = vpack.c.bf16 %v114_v34, %v113_v33  ;;  %v97_v37 = vld [vmem:[%s2861_s2 + $0x70] sm:$0xff]  ;;  %v98_v38 = vld [vmem:[%s2861_s2 + $0x78] sm:$0xff]  ;;  %v402_v41 = vld [vmem:[%s2866_s7] sm:$0xff] }
  0x23   :  { %v2213_v39 = vpack.c.bf16 %v98_v38, %v97_v37  ;;  %405 = vperm.xlu0 %2278, %v402_v41   ;;  %v727_v43 = vld [vmem:[%s2868_s9] sm:$0xf]  ;;  %v1051_v33 = vld [vmem:[%s2862_s3 + $0x8] sm:$0xff]  ;;  %v1053_v34 = vld [vmem:[%s2862_s3 + $0x18] sm:$0xff]  ;;  %s2325_s9 = smov 112  }
  0x24   :  { %183 = vmatmul.mubr.f32.vlgmr.msra.gmra.mrb[0].mxu0 %v2469_v25  ;;  %256 = vmatmul.mubr.f32.vlgmr.msra.gmra.mrb[0].mxu1 %v2478_v27  ;;  %v401_v50 = vld [vmem:[%s2865_s6] sm:$0xff]  ;;  %v1052_v37 = vld [vmem:[%s2862_s3 + $0x10] sm:$0xff]  ;;  %v1057_v41 = vld [vmem:[%s2863_s4 + $0x18] sm:$0xff] }
  0x25   :  { %2186 = vmatpush3.bf16.msra.mxu0 %v2185_v59  ;;  %2218 = vmatpush3.bf16.msra.mxu1 %v2185_v59  ;;  %v889_v57 = vld [vmem:[%s2870_s11] sm:$0xf]  ;;  %s2328_s11 = smov 15  }
  0x26   :  { %2188 = vmatprep.subr.bf16.mxu0 %v2187_v60  ;;  %2220 = vmatprep.subr.bf16.mxu1 %v2187_v60  ;;  %v725_v9 = vld [vmem:[%s2867_s8] sm:$0xf]  ;;  %s2327_s8 = smov 16  }
  0x27   :  { %325 = vmatprep.mubr.f32.mxu0 %v2473_v26  ;;  %395 = vmatprep.mubr.f32.mxu1 %v2482_v29  ;;  %v726_v32 = vld [vmem:[%s2869_s10] sm:$0xf] }
  0x28   :  { %730 = vperm.xlu0 %2278, %v727_v43   ;;  %892 = vperm.xlu1 %2279, %v889_v57   ;;  %v1056_v57 = vld [vmem:[%s2863_s4 + $0x10] sm:$0xff] }
  0x29   :  { %2190 = vmatpush3.bf16.msra.mxu0 %v2189_v1  ;;  %2222 = vmatpush3.bf16.msra.mxu1 %v2189_v1 }
  0x2a   :  { %2192 = vmatprep.subr.bf16.mxu0 %v2191_v2  ;;  %2224 = vmatprep.subr.bf16.mxu1 %v2191_v2 }
  0x2d   :  { %2194 = vmatpush3.bf16.msra.mxu0 %v2193_v7  ;;  %2226 = vmatpush3.bf16.msra.mxu1 %v2193_v7 }
  0x2e   :  { %2196 = vmatprep.subr.bf16.mxu0 %v2195_v8  ;;  %2228 = vmatprep.subr.bf16.mxu1 %v2195_v8 }
  0x31   :  { %2198 = vmatpush3.bf16.msra.mxu0 %v2197_v13  ;;  %2230 = vmatpush3.bf16.msra.mxu1 %v2197_v13 }
  0x32   :  { %2200 = vmatprep.subr.bf16.mxu0 %v2199_v14  ;;  %2232 = vmatprep.subr.bf16.mxu1 %v2199_v14 }
  0x35   :  { %2202 = vmatpush3.bf16.msra.mxu0 %v2201_v19  ;;  %2234 = vmatpush3.bf16.msra.mxu1 %v2201_v19 }
  0x36   :  { %2204 = vmatprep.subr.bf16.mxu0 %v2203_v20  ;;  %2236 = vmatprep.subr.bf16.mxu1 %v2203_v20 }
  0x39   :  { %2206 = vmatpush3.bf16.msra.mxu0 %v2205_v28  ;;  %2238 = vmatpush3.bf16.msra.mxu1 %v2205_v28 }
  0x3a   :  { %2208 = vmatprep.subr.bf16.mxu0 %v2207_v30  ;;  %2240 = vmatprep.subr.bf16.mxu1 %v2207_v30 }
  0x3d   :  { %2210 = vmatpush3.bf16.msra.mxu0 %v2209_v35  ;;  %2242 = vmatpush3.bf16.msra.mxu1 %v2209_v35  ;;  %v1050_v35 = vld [vmem:[%s2862_s3] sm:$0xff] }
  0x3e   :  { %2212 = vmatprep.subr.bf16.mxu0 %v2211_v36  ;;  %2244 = vmatprep.subr.bf16.mxu1 %v2211_v36  ;;  %v2247_v36 = vpack.c.bf16 %v1053_v34, %v1051_v33  ;;  %v2249_v38 = vpack.c.bf16 %v1052_v37, %v1050_v35 }
  0x41   :  { %2214 = vmatpush3.bf16.msra.mxu0 %v2213_v39  ;;  %2246 = vmatpush3.bf16.msra.mxu1 %v2213_v39  ;;  %v1055_v39 = vld [vmem:[%s2863_s4 + $0x8] sm:$0xff] }
  0x42   :  { %2079 = vmatprep.subr.mxu0 %v2322_v40  ;;  %2084 = vmatprep.subr.mxu1 %v2322_v40  ;;  %v2255_v42 = vpack.c.bf16 %v1057_v41, %v1055_v39 }
  0x44   :  { %326 = vmatmul.mubr.f32.vlgmr.msra.gmra.mrb[2].mxu0 %v2469_v25  ;;  %396 = vmatmul.mubr.f32.vlgmr.msra.gmra.mrb[2].mxu1 %v2478_v27 }
  0x45   :  { %2081 = vmatprep.mubr.msk.f32.mxu0 %vm2323_vm0, %v2322_v40  ;;  %2086 = vmatprep.mubr.msk.f32.mxu1 %vm2323_vm0, %v2322_v40 }
  0xa2   :  { %v406_v58 = vpop.permute.xlu0 %405 }
  0xa7   :  { %v731_v43 = vpop.permute.xlu0 %730 }
  0xf7   :  { %v1955_v44 = vpop.f32.mrb[0].mxu0  ;;  %v1990_v45 = vpop.f32.mrb[0].mxu1 }
  0xf8   :  { %v1956_v46 = vpop.f32.mrb[1].mxu0  ;;  %v1991_v47 = vpop.f32.mrb[1].mxu1 }
  0xf9   :  { %v1957_v48 = vadd.f32 %v1956_v46, %v1955_v44  ;;  %v1992_v49 = vadd.f32 %v1991_v47, %v1990_v45 }
  0xfb   :  { %2080 = vmatpush3.msk.msra.mxu0 %vm412_vm1, %v1957_v48  ;;  %2085 = vmatpush3.msk.msra.mxu1 %vm412_vm1, %v1992_v49 }
  0xfc   :  { %2082 = vmatmul.mubr.msk.f32.vlgmr.msra.gmra.mrb[4].mxu0 %vm408_vm2, %v401_v50  ;;  %2087 = vmatmul.mubr.msk.f32.vlgmr.msra.gmra.mrb[4].mxu1 %vm408_vm2, %v401_v50 }
  0xfd   :  { %2089 = vmatprep.subr.mxu0 %v2322_v40  ;;  %2094 = vmatprep.subr.mxu1 %v2322_v40 }
  0xfe   :  { %2091 = vmatprep.mubr.msk.f32.mxu0 %vm2323_vm0, %v2322_v40  ;;  %2096 = vmatprep.mubr.msk.f32.mxu1 %vm2323_vm0, %v2322_v40 }
 0x117   :  { %v2025_v51 = vpop.f32.mrb[2].mxu0  ;;  %v2060_v52 = vpop.f32.mrb[2].mxu1 }
 0x118   :  { %v2026_v53 = vpop.f32.mrb[3].mxu0  ;;  %v2061_v54 = vpop.f32.mrb[3].mxu1 }
 0x119   :  { %v2027_v55 = vadd.f32 %v2026_v53, %v2025_v51  ;;  %v2062_v56 = vadd.f32 %v2061_v54, %v2060_v52 }
 0x11b   :  { %2090 = vmatpush3.msk.msra.mxu0 %vm412_vm1, %v2027_v55  ;;  %2095 = vmatpush3.msk.msra.mxu1 %vm412_vm1, %v2062_v56  ;;  %v1054_v56 = vld [vmem:[%s2863_s4] sm:$0xff] }
 0x11c   :  { %2092 = vmatmul.mubr.msk.f32.vlgmr.msra.gmra.mrb[6].mxu0 %vm408_vm2, %v401_v50  ;;  %2097 = vmatmul.mubr.msk.f32.vlgmr.msra.gmra.mrb[6].mxu1 %vm408_vm2, %v401_v50 }
 0x11d   :  { %2099 = vmatprep.subr.mxu0 %v2322_v40  ;;  %2104 = vmatprep.subr.mxu1 %v2322_v40 }
 0x11e   :  { %2101 = vmatprep.mubr.msk.f32.mxu0 %vm2323_vm0, %v2322_v40  ;;  %2106 = vmatprep.mubr.msk.f32.mxu1 %vm2323_vm0, %v2322_v40 }
 0x1cf   :  { %v482_v59 = vpop.f32.mrb[4].mxu0  ;;  %v555_v60 = vpop.f32.mrb[4].mxu1 }
 0x1d0   :  { %v483_v61 = vadd.f32 %v482_v59, %v406_v58  ;;  %v556_v62 = vadd.f32 %v555_v60, %v406_v58  ;;  %v2083_v63 = vpop.f32.mrb[5].mxu0  ;;  %v2088_v0 = vpop.f32.mrb[5].mxu1 }
 0x1d2   :  { %v559_v1 = vadd.f32 3.0, %v483_v61  ;;  %v560_v2 = vadd.f32 3.0, %v556_v62 }
 0x1d4   :  { %v561_v3 = vmax.f32 %v559_v1, 0.0  ;;  %v562_v4 = vmax.f32 %v560_v2, 0.0 }
 0x1d6   :  { %v563_v5 = vmin.f32 %v561_v3, 6.0  ;;  %v564_v6 = vmin.f32 %v562_v4, 6.0 }
 0x1d8   :  { %v565_v7 = vmul.f32 %v563_v5, %v483_v61  ;;  %v566_v8 = vmul.f32 %v564_v6, %v556_v62  ;;  %v893_v61 = vpop.permute.xlu1 %892 }
 0x1da   :  { %v567_v10 = vmul.f32 0.16666667, %v565_v7  ;;  %v568_v11 = vmul.f32 0.16666667, %v566_v8 }
 0x1dc   :  { %2100 = vmatpush3.msra.mxu0 %v567_v10  ;;  %2105 = vmatpush3.msra.mxu1 %v568_v11 }
 0x1dd   :  { %2102 = vmatmul.mubr.msk.f32.vlgmr.msra.gmra.mrb[8].mxu0 %vm733_vm3, %v725_v9  ;;  %2107 = vmatmul.mubr.msk.f32.vlgmr.msra.gmra.mrb[8].mxu1 %vm733_vm3, %v725_v9 }
 0x1de   :  { %2109 = vmatprep.subr.mxu0 %v2322_v40  ;;  %2114 = vmatprep.subr.mxu1 %v2322_v40 }
 0x1df   :  { %2111 = vmatprep.mubr.msk.f32.mxu0 %vm2323_vm0, %v2322_v40  ;;  %2116 = vmatprep.mubr.msk.f32.mxu1 %vm2323_vm0, %v2322_v40 }
 0x1ef   :  { %v638_v12 = vpop.f32.mrb[6].mxu0  ;;  %v711_v13 = vpop.f32.mrb[6].mxu1 }
 0x1f0   :  { %v639_v14 = vadd.f32 %v638_v12, %v406_v58  ;;  %v712_v15 = vadd.f32 %v711_v13, %v406_v58  ;;  %v2093_v16 = vpop.f32.mrb[7].mxu0  ;;  %v2098_v17 = vpop.f32.mrb[7].mxu1  ;;  %v2257_v58 = vpack.c.bf16 %v1056_v57, %v1054_v56 }
 0x1f2   :  { %v715_v18 = vadd.f32 3.0, %v639_v14  ;;  %v716_v19 = vadd.f32 3.0, %v712_v15 }
 0x1f4   :  { %v717_v20 = vmax.f32 %v715_v18, 0.0  ;;  %v718_v21 = vmax.f32 %v716_v19, 0.0  ;;  %v1549_v18 = vlaneseq }
 0x1f6   :  { %v719_v22 = vmin.f32 %v717_v20, 6.0  ;;  %v720_v23 = vmin.f32 %v718_v21, 6.0  ;;  %v2738_v19 = vshrl.u32 %v1549_v18, 7 }
 0x1f8   :  { %v721_v24 = vmul.f32 %v719_v22, %v639_v14  ;;  %v722_v28 = vmul.f32 %v720_v23, %v712_v15  ;;  %v1641_v20 = vsub.s32 4, %v2738_v19 }
 0x1fa   :  { %v723_v30 = vmul.f32 0.16666667, %v721_v24  ;;  %v724_v31 = vmul.f32 0.16666667, %v722_v28  ;;  %v2749_v24 = vld [vmem:[%s2864_s5 + $0x8] sm:$0xff] }
 0x1fb   :  { %v1646_v35 = vrot.slane %v2749_v24, %v1641_v20 }
 0x1fc   :  { %2110 = vmatpush3.msra.mxu0 %v723_v30  ;;  %2115 = vmatpush3.msra.mxu1 %v724_v31 }
 0x1fd   :  { %2112 = vmatmul.mubr.msk.f32.vlgmr.msra.gmra.mrb[10].mxu0 %vm733_vm3, %v726_v32  ;;  %2117 = vmatmul.mubr.msk.f32.vlgmr.msra.gmra.mrb[10].mxu1 %vm733_vm3, %v726_v32 }
 0x1fe   :  { %1126 = vmatprep.mubr.f32.mxu0 %v2322_v40  ;;  %1200 = vmatprep.mubr.f32.mxu1 %v2322_v40 }
 0x1ff   :  { %2248 = vmatprep.subr.bf16.mxu0 %v2247_v36  ;;  %2252 = vmatprep.subr.bf16.mxu1 %v2247_v36 }
 0x200   :  { %2250 = vmatpush1.bf16.msra.mxu0 %v2249_v38  ;;  %2254 = vmatpush1.bf16.msra.mxu1 %v2249_v38 }
 0x201   :  { %2256 = vmatprep.subr.bf16.mxu0 %v2255_v42  ;;  %2260 = vmatprep.subr.bf16.mxu1 %v2255_v42 }
 0x2b0   :  { %v803_v44 = vpop.f32.mrb[8].mxu0  ;;  %v873_v45 = vpop.f32.mrb[8].mxu1 }
 0x2b1   :  { %v804_v46 = vadd.f32 %v803_v44, %v731_v43  ;;  %v874_v47 = vadd.f32 %v873_v45, %v731_v43  ;;  %v2103_v48 = vpop.f32.mrb[9].mxu0  ;;  %v2108_v49 = vpop.f32.mrb[9].mxu1 }
 0x2b3   :  { %v1903_v50 = vmul.f32 -1.442695, %v804_v46  ;;  %v1904_v51 = vmul.f32 -1.442695, %v874_v47 }
 0x2b5   :  { %2282 = vpow2.f32 %v1903_v50 }
 0x2b6   :  { %2284 = vpow2.f32 %v1904_v51 }
 0x2bf   :  { %v2283_v52 = vpop.eup %2282 }
 0x2c0   :  { %v2285_v53 = vpop.eup %2284  ;;  %v883_v54 = vadd.f32 1.0, %v2283_v52 }
 0x2c1   :  { %v884_v55 = vadd.f32 1.0, %v2285_v53 }
 0x2c2   :  { %2286 = vrcp.f32 %v883_v54 }
 0x2c3   :  { %2288 = vrcp.f32 %v884_v55 }
 0x2cc   :  { %v2287_v59 = vpop.eup %2286 }
 0x2cd   :  { %v2289_v60 = vpop.eup %2288  ;;  %1909 = vmatmul.mubr.msk.f32.vlgmr.msra.gmra.mrb[12].mxu0 %vm1058_vm4, %v2287_v59 }
 0x2ce   :  { %1910 = vmatmul.mubr.msk.f32.vlgmr.msra.gmra.mrb[12].mxu1 %vm1058_vm4, %v2289_v60  ;;  %2258 = vmatpush1.bf16.msra.mxu0 %v2257_v58 }
 0x2cf   :  { %2262 = vmatpush1.bf16.msra.mxu1 %v2257_v58  ;;  %1274 = vmatprep.mubr.f32.mxu0 %v2322_v40 }
 0x2d0   :  { %v964_v62 = vpop.f32.mrb[10].mxu0  ;;  %v1034_v63 = vpop.f32.mrb[10].mxu1  ;;  %1348 = vmatprep.mubr.f32.mxu1 %v2322_v40  ;;  %1913 = vmatprep.subr.msk.mxu0 %vm412_vm1, %v2473_v26  ;;  %v1355_v26 = vld [vmem:[%s2871_s12] sm:$0xff] }
 0x2d1   :  { %v965_v0 = vadd.f32 %v964_v62, %v893_v61  ;;  %v1035_v1 = vadd.f32 %v1034_v63, %v893_v61  ;;  %v2113_v2 = vpop.f32.mrb[11].mxu0  ;;  %v2118_v3 = vpop.f32.mrb[11].mxu1  ;;  %1917 = vmatprep.subr.msk.mxu1 %vm412_vm1, %v2482_v29  ;;  %v1356_v29 = vld [vmem:[%s2871_s12 + $0x8] sm:$0x1] }
 0x2d3   :  { %v1907_v4 = vmul.f32 -1.442695, %v965_v0  ;;  %v1908_v5 = vmul.f32 -1.442695, %v1035_v1 }
 0x2d5   :  { %2290 = vpow2.f32 %v1907_v4 }
 0x2d6   :  { %2292 = vpow2.f32 %v1908_v5 }
 0x2df   :  { %v2291_v6 = vpop.eup %2290 }
 0x2e0   :  { %v2293_v7 = vpop.eup %2292  ;;  %v1044_v8 = vadd.f32 1.0, %v2291_v6 }
 0x2e1   :  { %v1045_v9 = vadd.f32 1.0, %v2293_v7 }
 0x2e2   :  { %2294 = vrcp.f32 %v1044_v8 }
 0x2e3   :  { %2296 = vrcp.f32 %v1045_v9 }
 0x2ec   :  { %v2295_v10 = vpop.eup %2294 }
 0x2ed   :  { %v2297_v11 = vpop.eup %2296  ;;  %1911 = vmatmul.mubr.msk.f32.vlgmr.msra.gmra.mrb[14].mxu0 %vm1058_vm4, %v2295_v10 }
 0x2ee   :  { %1912 = vmatmul.mubr.msk.f32.vlgmr.msra.gmra.mrb[14].mxu1 %vm1058_vm4, %v2297_v11  ;;  %1914 = vmatpush1.msk.msra.mxu0 %vm412_vm1, %v2469_v25 }
 0x2ef   :  { %1431 = vmatprep.mubr.f32.mxu0 %v2322_v40  ;;  %1918 = vmatpush1.msk.msra.mxu1 %vm412_vm1, %v2478_v27 }
 0x2f0   :  { %1512 = vmatprep.mubr.f32.mxu1 %v2322_v40 }
 0x2f1   :  { %1915 = vmatmul.mubr.msk.f32.vlgmr.msra.gmra.mrb[16].mxu0 %vm408_vm2, %v1355_v26 }
 0x2f2   :  { %1919 = vmatmul.mubr.msk.f32.vlgmr.msra.gmra.mrb[16].mxu1 %vm408_vm2, %v1355_v26  ;;  %1437 = vmatprep.mubr.f32.mxu0 %v2322_v40 }
 0x2f3   :  { %1518 = vmatprep.mubr.f32.mxu1 %v2322_v40  ;;  %v2744_v40 = vld [vmem:[%s2864_s5] sm:$0xff] }
 0x2f4   :  { %v1642_v31 = vrot.slane %v2744_v40, %v1641_v20 }
 0x2f5   :  { %1916 = vmatmul.mubr.msk.f32.gmra.mrb[18].mxu0 %vm408_vm2, %v1356_v29 }
 0x2f6   :  { %1920 = vmatmul.mubr.msk.f32.gmra.mrb[18].mxu1 %vm408_vm2, %v1356_v29 }
 0x3a0   :  { %v1128_v12 = vpop.f32.mrb[12].mxu0 }
 0x3a1   :  { %v1202_v13 = vpop.f32.mrb[12].mxu1  ;;  %v1130_v14 = vpop.f32.mrb[13].mxu0 }
 0x3a2   :  { %v1822_v15 = vcombine.low %v1128_v12, %v1130_v14  ;;  %v1204_v16 = vpop.f32.mrb[13].mxu1 }
 0x3a3   :  { %v1823_v17 = vcombine.low %v1202_v13, %v1204_v16 }
 0x3c0   :  { %v1276_v21 = vpop.f32.mrb[14].mxu0 }
 0x3c1   :  { %v1350_v22 = vpop.f32.mrb[14].mxu1  ;;  %v1278_v23 = vpop.f32.mrb[15].mxu0 }
 0x3c2   :  { %v1812_v28 = vcombine.low %v1276_v21, %v1278_v23  ;;  %v1352_v30 = vpop.f32.mrb[15].mxu1 }
 0x3c3   :  { %v1813_v32 = vcombine.low %v1350_v22, %v1352_v30  ;;  %v2788_v22 = vsub.s32 0, %v2738_v19 }
 0x3c4   :  { %v1816_v33 = vmul.f32 %v1812_v28, %v2469_v25  ;;  %v1433_v34 = vpop.f32.mrb[16].mxu0  ;;  %v2791_v28 = vsub.s32 1, %v2738_v19 }
 0x3c5   :  { %v1817_v36 = vmul.f32 %v1813_v32, %v2478_v27  ;;  %v1514_v37 = vpop.f32.mrb[16].mxu1  ;;  %1725 = vrot.lane.b32.xlu1 %v1433_v34, %s2325_s9  ;;  %v1435_v38 = vpop.f32.mrb[17].mxu0  ;;  %v1561_v39 = vrot.slane %v1433_v34, 1  ;;  %v1585_v41 = vrot.slane %v1433_v34, 2  ;;  %v1647_v47 = vmul.f32 %v1642_v31, %v1433_v34 }
 0x3c6   :  { %v2756_v42 = vmul.f32 %v1822_v15, %v1816_v33  ;;  %v1535_v43 = vrot.slane %v1514_v37, 7  ;;  %v1649_v44 = vmul.f32 %v1642_v31, %v1514_v37  ;;  %v1516_v25 = vpop.f32.mrb[17].mxu1  ;;  %1727 = vrot.lane.b32.xlu0 %v1435_v38, %s2325_s9  ;;  %v1563_v45 = vrot.slane %v1435_v38, 1 }
 0x3c7   :  { %v2759_v46 = vmul.f32 %v1823_v17, %v1817_v36  ;;  %v1538_v27 = vrot.slane %v1516_v25, 7  ;;  %v1562_v48 = vsel %vm1536_vm5, %v1514_v37, %v1561_v39  ;;  %v1650_v49 = vmul.f32 %v1646_v35, %v1516_v25 }
 0x3c8   :  { %v1537_v50 = vsel %vm1536_vm5, %v1535_v43, %v1433_v34  ;;  %v1564_v51 = vsel %vm1536_vm5, %v1516_v25, %v1563_v45  ;;  %v1586_v52 = vrot.slane %v1514_v37, 1  ;;  %v1439_v53 = vpop.f32.mrb[18].mxu0  ;;  %v1656_v54 = vrot.slane %v1649_v44, 3 }
 0x3c9   :  { %1540 = vrot.lane.b32.xlu1 %v1537_v50, %s2326_s28  ;;  %v1539_v55 = vsel %vm1536_vm5, %v1538_v27, %v1435_v38  ;;  %v1588_v56 = vrot.slane %v1435_v38, 2  ;;  %v1589_v57 = vrot.slane %v1516_v25, 1  ;;  %v1520_v58 = vpop.f32.mrb[18].mxu1  ;;  %v1441_v59 = vpop.f32.mrb[19].mxu0  ;;  %v1612_v61 = vrot.slane %v1433_v34, 3 }
 0x3ca   :  { %1542 = vrot.lane.b32.xlu0 %v1539_v55, %s2326_s28  ;;  %v1587_v60 = vsel %vm1536_vm5, %v1586_v52, %v1585_v41  ;;  %v1613_v62 = vrot.slane %v1514_v37, 2  ;;  %v1615_v63 = vrot.slane %v1435_v38, 3  ;;  %v1522_v0 = vpop.f32.mrb[19].mxu1  ;;  %v1616_v2 = vrot.slane %v1516_v25, 2 }
 0x3cb   :  { %v1590_v1 = vsel %vm1536_vm5, %v1589_v57, %v1588_v56  ;;  %v1666_v3 = vsel %vm1665_vm6, %v1535_v43, %v1433_v34  ;;  %v1667_v4 = vsel %vm1665_vm6, %v1538_v27, %v1435_v38  ;;  %v1696_v6 = vsel %vm1695_vm7, %v1535_v43, %v1433_v34 }
 0x3cc   :  { %v1614_v5 = vsel %vm1536_vm5, %v1613_v62, %v1612_v61  ;;  %v1697_v7 = vsel %vm1695_vm7, %v1538_v27, %v1435_v38  ;;  %v1773_v8 = vrot.slane %v1520_v58, 7  ;;  %v1617_v9 = vsel %vm1536_vm5, %v1616_v2, %v1615_v63 }
 0x3cd   :  { %1565 = vrot.lane.b32.xlu1 %v1562_v48, %s2327_s8  ;;  %v1775_v10 = vrot.slane %v1522_v0, 7  ;;  %v1655_v26 = vrot.slane %v1647_v47, 4  ;;  %v1659_v29 = vrot.slane %v1650_v49, 3  ;;  %v1648_v13 = vmul.f32 %v1646_v35, %v1435_v38 }
 0x3ce   :  { %1567 = vrot.lane.b32.xlu0 %v1564_v51, %s2327_s8  ;;  %v1774_v11 = vsel %vm1536_vm5, %v1773_v8, %v1439_v53  ;;  %v1602_v31 = vsub.s32 2, %v2738_v19  ;;  %v1552_v32 = vrot.slane %v2744_v40, %v2788_v22  ;;  %v1556_v33 = vrot.slane %v2749_v24, %v2788_v22 }
 0x3cf   :  { %v1776_v12 = vsel %vm1536_vm5, %v1775_v10, %v1441_v59  ;;  %v2776_v14 = vsel %vm1536_vm5, %v1656_v54, %v1655_v26  ;;  %v1658_v15 = vrot.slane %v1648_v13, 4  ;;  %v1576_v37 = vrot.slane %v2744_v40, %v2791_v28 }
 0x3d0   :  { %v1580_v38 = vrot.slane %v2749_v24, %v2791_v28  ;;  %v1629_v41 = vsub.s32 3, %v2738_v19  ;;  %v1603_v25 = vrot.slane %v2744_v40, %v1602_v31  ;;  %v1530_v48 = vstv %s2872_s13 }
 0x3d1   :  { %1591 = vrot.lane.b32.xlu1 %v1587_v60, %s2328_s11  ;;  %v2779_v16 = vsel %vm1536_vm5, %v1659_v29, %v1658_v15  ;;  %v1679_v52 = vsub.s32 5, %v2738_v19  ;;  %v1709_v60 = vsub.s32 6, %v2738_v19 }
 0x3d2   :  { %1593 = vrot.lane.b32.xlu0 %v1590_v1, %s2328_s11  ;;  %v1630_v55 = vrot.slane %v2744_v40, %v1629_v41  ;;  %v1634_v56 = vrot.slane %v2749_v24, %v1629_v41  ;;  %v1744_v1 = vsub.s32 7, %v2738_v19 }
 0x3d3   :  { %v1714_v13 = vrot.slane %v2749_v24, %v1709_v60 }
 0x3d5   :  { %1618 = vrot.lane.b32.xlu1 %v1614_v5, %s2329_s29 }
 0x3d6   :  { %1620 = vrot.lane.b32.xlu0 %v1617_v9, %s2329_s29 }
 0x3d9   :  { %1668 = vrot.lane.b32.xlu1 %v1666_v3, %s2330_s30  ;;  %v1680_v3 = vrot.slane %v2744_v40, %v1679_v52 }
 0x3da   :  { %1670 = vrot.lane.b32.xlu0 %v1667_v4, %s2330_s30  ;;  %v1684_v4 = vrot.slane %v2749_v24, %v1679_v52 }
 0x3dd   :  { %1698 = vrot.lane.b32.xlu1 %v1696_v6, %s2331_s15 }
 0x3de   :  { %1700 = vrot.lane.b32.xlu0 %v1697_v7, %s2331_s15 }
 0x3e1   :  { %1729 = vrot.lane.b32.xlu1 %v1535_v43, %s2325_s9 }
 0x3e2   :  { %1731 = vrot.lane.b32.xlu0 %v1538_v27, %s2325_s9  ;;  %v1607_v27 = vrot.slane %v2749_v24, %v1602_v31 }
 0x3e5   :  { %1777 = vrot.lane.b32.xlu1 %v1774_v11, %s2332_s16 }
 0x3e6   :  { %1779 = vrot.lane.b32.xlu0 %v1776_v12, %s2332_s16  ;;  %v1710_v12 = vrot.slane %v2744_v40, %v1709_v60 }
 0x437   :  { %v2783_v17 = vpop.permute.xlu1 %1725 }
 0x438   :  { %v2785_v18 = vpop.permute.xlu0 %1727 }
 0x43b   :  { %v1541_v20 = vpop.permute.xlu1 %1540 }
 0x43c   :  { %v1543_v21 = vpop.permute.xlu0 %1542  ;;  %v1548_v34 = vsel %vm1544_vm8, 0.0, %v1541_v20 }
 0x43d   :  { %v1545_v35 = vsel %vm1544_vm8, %v1541_v20, %v1543_v21  ;;  %v1557_v45 = vmul.f32 %v1552_v32, %v1548_v34  ;;  %v1734_v34 = vsel %vm1733_vm12, %v2783_v17, %v2785_v18 }
 0x43e   :  { %v1558_v47 = vmul.f32 %v1556_v33, %v1545_v35  ;;  %v1740_v35 = vsel %vm1733_vm12, %v2785_v18, 0.0 }
 0x43f   :  { %v1566_v23 = vpop.permute.xlu1 %1565  ;;  %v1559_v61 = vadd.f32 %v1557_v45, %v1530_v48 }
 0x440   :  { %v1568_v30 = vpop.permute.xlu0 %1567  ;;  %v1572_v43 = vsel %vm1058_vm4, 0.0, %v1566_v23  ;;  %v1560_v62 = vadd.f32 %v1558_v47, %v1530_v48 }
 0x441   :  { %v1569_v44 = vsel %vm1058_vm4, %v1566_v23, %v1568_v30  ;;  %v1581_v53 = vmul.f32 %v1576_v37, %v1572_v43  ;;  %v1745_v23 = vrot.slane %v2744_v40, %v1744_v1  ;;  %v1749_v30 = vrot.slane %v2749_v24, %v1744_v1 }
 0x442   :  { %v1582_v54 = vmul.f32 %v1580_v38, %v1569_v44 }
 0x443   :  { %v1592_v36 = vpop.permute.xlu1 %1591  ;;  %v1583_v5 = vadd.f32 %v1581_v53, %v1559_v61  ;;  %v1750_v24 = vmul.f32 %v1745_v23, %v1734_v34  ;;  %v1751_v44 = vmul.f32 %v1749_v30, %v1740_v35 }
 0x444   :  { %v1594_v39 = vpop.permute.xlu0 %1593  ;;  %v1599_v49 = vsel %vm1595_vm9, 0.0, %v1592_v36  ;;  %v1584_v6 = vadd.f32 %v1582_v54, %v1560_v62  ;;  %v1921_v54 = vld [vmem:[%s2864_s5 + $0x10] ss:$0 sm:$0xff] }
 0x445   :  { %v1596_v50 = vsel %vm1595_vm9, %v1592_v36, %v1594_v39  ;;  %v1608_v63 = vmul.f32 %v1603_v25, %v1599_v49 }
 0x446   :  { %v1609_v0 = vmul.f32 %v1607_v27, %v1596_v50 }
 0x447   :  { %v1619_v51 = vpop.permute.xlu1 %1618  ;;  %v1610_v26 = vadd.f32 %v1608_v63, %v1583_v5 }
 0x448   :  { %v1621_v57 = vpop.permute.xlu0 %1620  ;;  %v1626_v58 = vsel %vm1622_vm10, 0.0, %v1619_v51  ;;  %v1611_v29 = vadd.f32 %v1609_v0, %v1584_v6 }
 0x449   :  { %v1623_v59 = vsel %vm1622_vm10, %v1619_v51, %v1621_v57  ;;  %v1635_v7 = vmul.f32 %v1630_v55, %v1626_v58  ;;  %v1762_v55 = vrot.slane %v1751_v44, 7 }
 0x44a   :  { %v1636_v8 = vmul.f32 %v1634_v56, %v1623_v59 }
 0x44b   :  { %v1669_v2 = vpop.permute.xlu1 %1668  ;;  %v1637_v31 = vadd.f32 %v1635_v7, %v1610_v26  ;;  %v2333_v7 = vmov 1966171168  }
 0x44c   :  { %v1671_v9 = vpop.permute.xlu0 %1670  ;;  %v1638_v32 = vadd.f32 %v1636_v8, %v1611_v29  ;;  %v1832_v8 = vunpack.c.l.s4 %v2333_v7 }
 0x44d   :  { %v1673_v10 = vsel %vm1672_vm11, %v1669_v2, %v1671_v9  ;;  %v1676_v11 = vsel %vm1672_vm11, %v1671_v9, 0.0  ;;  %v1663_v25 = vadd.f32 %v2776_v14, %v1637_v31  ;;  %v1922_v14 = vld [vmem:[%s2864_s5 + $0x18] ss:$0 sm:$0xff]  ;;  %s2334_s5 = smov [#allocation3]  }
 0x44e   :  { %v1685_v15 = vmul.f32 %v1680_v3, %v1673_v10  ;;  %v1686_v20 = vmul.f32 %v1684_v4, %v1676_v11  ;;  %v1664_v45 = vadd.f32 %v2779_v16, %v1638_v32  ;;  %v1759_v16 = vrot.slane %v1750_v24, 7  ;;  %s1882_s21 = sshll.u32 %s2334_s5, 4  ;;  %s1883_s21 = int_to_ptr.vmem [resolvable:$true] %s1882_s21 }
 0x44f   :  { %v1699_v21 = vpop.permute.xlu1 %1698  ;;  %v1833_v29 = vunpack.c.0.s8 %v1832_v8  ;;  %s2298_s1 = scalar_lea.vmem %s1883_s21, 256  ;;  %p2303_p1 = scmp.lt.s32.totalorder %s1883_s21, %s1883_s21 }
 0x450   :  { %v1701_v33 = vpop.permute.xlu0 %1700  ;;  %v1689_v41 = vrot.slane %v1685_v15, 5  ;;  %v1690_v40 = vrot.slane %v1686_v20, 5  ;;  %p2299_p0 = scmp.ne.s32.totalorder %s1883_s21, %s2298_s1  ;;  %p2304_p2 = scmp.lt.s32.totalorder %s2298_s1, %s2298_s1 }
 0x451   :  { %v1703_v36 = vsel %vm1702_vm13, %v1699_v21, %v1701_v33  ;;  %v1706_v37 = vsel %vm1702_vm13, %v1701_v33, 0.0  ;;  %v1836_v21 = vsub.s32 %v1833_v29, %v2738_v19 }
 0x452   :  { %v1715_v38 = vmul.f32 %v1710_v12, %v1703_v36  ;;  %v1716_v39 = vmul.f32 %v1714_v13, %v1706_v37  ;;  %v1693_v51 = vadd.f32 %v1689_v41, %v1663_v25  ;;  %v1694_v52 = vadd.f32 %v1690_v40, %v1664_v45  ;;  %p2305_p3 = por %p2304_p2, %p2303_p1 }
 0x453   :  { %v1730_v43 = vpop.permute.xlu1 %1729 }
 0x454   :  { %v1732_v47 = vpop.permute.xlu0 %1731  ;;  %v1719_v17 = vrot.slane %v1715_v38, 6  ;;  %v1720_v27 = vrot.slane %v1716_v39, 6  ;;  %p2306_p4 = pnand %p2305_p3, %p2299_p0 }
 0x455   :  { %v1735_v18 = vsel %vm1733_vm12, %v1730_v43, %v1732_v47  ;;  %v1741_v48 = vsel %vm1733_vm12, %v1732_v47, 0.0 }
 0x456   :  { %v1752_v49 = vmul.f32 %v1745_v23, %v1735_v18  ;;  %v1753_v50 = vmul.f32 %v1749_v30, %v1741_v48  ;;  %v1723_v59 = vadd.f32 %v1719_v17, %v1693_v51  ;;  %v1724_v60 = vadd.f32 %v1720_v27, %v1694_v52 }
 0x457   :  { %v1778_v53 = vpop.permute.xlu1 %1777 }
 0x458   :  { %v1760_v56 = vrot.slane %v1752_v49, 7  ;;  %v1763_v57 = vrot.slane %v1753_v50, 7  ;;  %v1780_v58 = vpop.permute.xlu0 %1779 }
 0x459   :  { %v1782_v61 = vsel %vm1781_vm14, %v1778_v53, %v1780_v58  ;;  %v1785_v62 = vsel %vm1781_vm14, %v1780_v58, 0.0 }
 0x45a   :  { %v1761_v63 = vsel %vm1758_vm15, %v1759_v16, %v1760_v56  ;;  %v1764_v0 = vsel %vm1758_vm15, %v1762_v55, %v1763_v57  ;;  %v1794_v1 = vmul.f32 %v1921_v54, %v1782_v61  ;;  %v1795_v2 = vmul.f32 %v1922_v14, %v1785_v62 }
 0x45b   :  { %v1767_v3 = vadd.f32 %v1761_v63, %v1723_v59  ;;  %v1768_v4 = vadd.f32 %v1764_v0, %v1724_v60 }
 0x45d   :  { %v1796_v5 = vadd.f32 %v1794_v1, %v1767_v3  ;;  %v1797_v6 = vadd.f32 %v1795_v2, %v1768_v4 }
 0x45f   :  { %v1798_v9 = vadd.f32 3.0, %v1796_v5  ;;  %v1799_v10 = vadd.f32 3.0, %v1797_v6 }
 0x461   :  { %v1800_v11 = vmax.f32 %v1798_v9, 0.0  ;;  %v1801_v26 = vmax.f32 %v1799_v10, 0.0 }
 0x463   :  { %v1802_v12 = vmin.f32 %v1800_v11, 6.0  ;;  %v1803_v13 = vmin.f32 %v1801_v26, 6.0 }
 0x465   :  { %v1804_v15 = vmul.f32 %v1802_v12, %v1796_v5  ;;  %v1805_v20 = vmul.f32 %v1803_v13, %v1797_v6 }
 0x467   :  { %v1806_v23 = vmul.f32 0.16666667, %v1804_v15  ;;  %v1807_v30 = vmul.f32 0.16666667, %v1805_v20 }
 0x469   :  { %v1830_v31 = vcombine.low %v1806_v23, %v1807_v30 }
 0x46b   :  { %v1837_v32 = vrot.slane %v1830_v31, %v1836_v21 }
 0x46d   :  { %v1838_v33 = vcombine.high %v1837_v32, %v1837_v32  ;;  %v1845_v34 = vrot.slane %v1837_v32, %v1836_v21 }
 0x46f   :  { %v1852_v35 = vrot.slane %v1838_v33, %v1836_v21  ;;  %v1856_v36 = vrot.slane %v1845_v34, %v2788_v22  ;;  %v1860_v37 = vrot.slane %v1845_v34, %v2791_v28 }
 0x471   :  { %v1864_v38 = vrot.slane %v1852_v35, %v2788_v22  ;;  %v1868_v39 = vrot.slane %v1852_v35, %v2791_v28  ;;  %v1869_v41 = vcombine.low %v1856_v36, %v1860_v37 }
 0x473   :  { %v1870_v40 = vcombine.low %v1864_v38, %v1868_v39  ;;  %v1873_v19 = vmul.f32 %v1869_v41, %v2756_v42 }
 0x475   :  { %v1874_v43 = vmul.f32 %v1870_v40, %v2759_v46  ;;  %1875 = vst [vmem:[#allocation3] sm:$0xff] %v1873_v19 }
 0x477   :  { %1876 = vst [vmem:[#allocation3 + $0x8] sm:$0xff] %v1874_v43 }
 0x478   :  { %2309 = shalt.err (!%p2306_p4)
}
 0x479   :  { %s2310_s23 = scalar_lea.hbm %s2873_s14, 256 }
 0x47a   :  { %p2311_p5 = scmp.ne.s32.totalorder %s2873_s14, %s2310_s23  ;;  %p2314_p6 = scmp.lt.u32.totalorder %s2310_s23, %s2873_s14 }
 0x47c   :  { %p2316_p7 = pnand %p2314_p6, %p2311_p5 }
 0x47e   :  { %2319 = shalt.err (!%p2316_p7)
}
 0x47f   :  { %s2335_s25 = smov 128   ;;  %s2336_s26 = smov 8  }
 0x480   :  { %1888 = dma.vmem_to_hbm [thread:$0]  %s1883_s21, 256, %s2873_s14, [#allocation4], %s2335_s25, %s2335_s25, %s2336_s26  }
 0x481   :  { %2320 = dma.done.wait [#allocation4], 256  }
 0x482   :  { %2321 = vsyncadd [#allocation4], 4294967040 }
 0x483   :  { %1892 = vsyncpa [#allocation4], 1 }

</bundles_post_ra>
